<compile_context>
chip_gen: v7x
topology: tpu7x:2x2x1
jax: 0.10.0
libtpu: 0.0.40
codegen_flags: <defaults>
</compile_context>

<pallas_src>
import jax
import jax.numpy as jnp
import numpy as np
from jax.experimental import pallas as pl


# ---------------------------------------------------------------------------
# Fused Pallas kernel: wavefront over (time, layer) + FC head, single invocation
# ---------------------------------------------------------------------------

def _make_fused_lstm_kernel(num_layers, T, B, H, O):
    """Kernel for fixed (num_layers, T, B, H, O).

    Ref order:
      x        (T*B, Din)    time-major flattened input
      w_x0     (Din, 4H)     layer-0 input-proj weight (transposed, i/f/o cols * 0.5)
      w_block  (L*H, L*4H)   block-structured recurrent/input weights (see pack_params)
      b_block  (1, L*4H)     per-layer combined biases (i/f/o cols * 0.5)
      fc_w     (1, H) if O == 1 else (H, O)
      fc_b     (1, O)
      out      (B, O)
    """
    H4 = 4 * H
    LH4 = num_layers * H4

    def kernel(x_ref, wx0_ref, wblk_ref, bblk_ref, fcw_ref, fcb_ref, o_ref):
        w_blk = wblk_ref[...]                                    # loop-invariant weights
        bias_b = jnp.broadcast_to(bblk_ref[...], (B, LH4))       # hoisted broadcast

        # Layer-0 input projection for the WHOLE sequence: one MXU dot.
        proj0 = jnp.dot(x_ref[...], wx0_ref[...],
                        preferred_element_type=jnp.float32)      # (T*B, 4H)
        # Per-timestep slices have no dependence on loop state -> off the recurrent chain.
        proj_t = [proj0[t * B:(t + 1) * B, :] for t in range(T)]

        # sigmoid(x) = 0.5 * tanh(x/2) + 0.5.  i/f/o columns were pre-halved in the weights,
        # so one full-width tanh + one affine recovers every gate.  Constant vregs hoisted.
        lane = jax.lax.broadcasted_iota(jnp.int32, (B, H4), 1)
        is_g = (lane >= 2 * H) & (lane < 3 * H)
        post_scale = jnp.where(is_g, 1.0, 0.5).astype(jnp.float32)
        post_off = jnp.where(is_g, 0.0, 0.5).astype(jnp.float32)

        def gate_update(gates, c_prev):
            act = jnp.tanh(gates)                    # single EUP pass over (B, 4H)
            act = act * post_scale + post_off        # [sig(i) | sig(f) | tanh(g) | sig(o)]
            i_g = act[:, 0:H]
            f_g = act[:, H:2 * H]
            g_g = act[:, 2 * H:3 * H]
            o_g = act[:, 3 * H:4 * H]
            c_new = f_g * c_prev + i_g * g_g
            h_new = o_g * jnp.tanh(c_new)
            return h_new, c_new

        h = [jnp.zeros((B, H), jnp.float32) for _ in range(num_layers)]
        c = [jnp.zeros((B, H), jnp.float32) for _ in range(num_layers)]

        # Wavefront: step s updates layer l at t = s - l for every active layer; all of a
        # step's matmuls are one block-structured dot on the PREVIOUS step's hidden states.
        for s in range(T + num_layers - 1):
            if s == 0:
                gates_all = bias_b                   # all hidden states are zero at s == 0
            else:
                h_cat = h[0] if num_layers == 1 else jnp.concatenate(h, axis=1)  # (B, L*H)
                gates_all = jnp.dot(h_cat, w_blk,
                                    preferred_element_type=jnp.float32) + bias_b
            lo = max(0, s - T + 1)
            hi = min(num_layers - 1, s)
            for l in range(lo, hi + 1):              # static unroll; inactive layers skipped
                g = gates_all[:, l * H4:(l + 1) * H4]          # 128-lane aligned slice
                if l == 0:
                    g = g + proj_t[s]
                h[l], c[l] = gate_update(g, c[l])

        h_last = h[-1]                               # h of top layer at t = T - 1
        if O == 1:
            # N == 1 MXU dot replaced by VPU multiply + lane reduce (no relayout/masked tail).
            out = jnp.sum(h_last * fcw_ref[...], axis=-1, keepdims=True) + fcb_ref[...]
        else:
            out = jnp.dot(h_last, fcw_ref[...],
                          preferred_element_type=jnp.float32) + fcb_ref[...]
        o_ref[...] = out.astype(o_ref.dtype)

    return kernel


# ---------------------------------------------------------------------------
# Wrappers
# ---------------------------------------------------------------------------

def pack_params(params):
    """One-time wrapper-side re-layout:
       * transpose weights to (in, out) for lane-major MXU use,
       * pre-scale i/f/o gate columns (weights AND biases) by 0.5 (sigmoid-via-tanh trick),
       * pack every layer's input/recurrent weights into one block matrix W_block so each
         wavefront step needs a single dot,
       * store the FC weight as a (1, H) row when output_size == 1 (VPU-reduce head).
    """
    layers = params["lstm"]
    L = len(layers)
    H = layers[0]["w_hh"].shape[1]
    H4 = 4 * H
    col_scale = jnp.asarray(
        np.concatenate([np.full(H, 0.5), np.full(H, 0.5),
                        np.full(H, 1.0), np.full(H, 0.5)]).astype(np.float32))[None, :]

    w_x0 = jnp.transpose(layers[0]["w_ih"]) * col_scale               # (Din, 4H)

    w_block = jnp.zeros((L * H, L * H4), jnp.float32)
    b_cols = []
    for l, layer in enumerate(layers):
        w_hh_t = jnp.transpose(layer["w_hh"]) * col_scale             # (H, 4H)
        w_block = w_block.at[l * H:(l + 1) * H, l * H4:(l + 1) * H4].set(w_hh_t)
        if l > 0:
            w_ih_t = jnp.transpose(layer["w_ih"]) * col_scale         # (H, 4H)
            w_block = w_block.at[(l - 1) * H:l * H, l * H4:(l + 1) * H4].set(w_ih_t)
        b_cols.append(layer["b"] * col_scale)                         # (1, 4H)
    b_block = jnp.concatenate(b_cols, axis=1)                         # (1, L*4H)

    O = params["fc_w"].shape[0]
    fc_w = params["fc_w"] if O == 1 else jnp.transpose(params["fc_w"])
    return {
        "num_layers": L, "hidden": H, "out_dim": O,
        "w_x0": w_x0, "w_block": w_block, "b_block": b_block,
        "fc_w": fc_w, "fc_b": params["fc_b"],
    }


def lstm_regression_forward(x, packed):
    """x: (B, input_dim, T) -- PyTorch (N, C, L) layout, matching the module's input."""
    B, Din, T = x.shape
    L, H, O = packed["num_layers"], packed["hidden"], packed["out_dim"]

    # (B, C, T) -> time-major flattened (T*B, C); done once in XLA, outside the kernel.
    x_tb = jnp.transpose(x, (2, 0, 1)).reshape(T * B, Din)

    return pl.pallas_call(
        _make_fused_lstm_kernel(L, T, B, H, O),
        out_shape=jax.ShapeDtypeStruct((B, O), jnp.float32),
    )(x_tb, packed["w_x0"], packed["w_block"], packed["b_block"],
      packed["fc_w"], packed["fc_b"])


# ---------------------------------------------------------------------------
# Deterministic parameter init (PyTorch-style uniform ranges) + pure-JAX reference
# ---------------------------------------------------------------------------

def init_params(key, input_dim, hidden_size, output_size, num_layers):
    params = {"lstm": []}
    k_lstm = 1.0 / np.sqrt(hidden_size)
    for layer in range(num_layers):
        din = input_dim if layer == 0 else hidden_size
        key, k1, k2, k3, k4 = jax.random.split(key, 5)
        w_ih = jax.random.uniform(k1, (4 * hidden_size, din), jnp.float32, -k_lstm, k_lstm)
        w_hh = jax.random.uniform(k2, (4 * hidden_size, hidden_size), jnp.float32, -k_lstm, k_lstm)
        b_ih = jax.random.uniform(k3, (4 * hidden_size,), jnp.float32, -k_lstm, k_lstm)
        b_hh = jax.random.uniform(k4, (4 * hidden_size,), jnp.float32, -k_lstm, k_lstm)
        params["lstm"].append({
            "w_ih": w_ih,
            "w_hh": w_hh,
            "b": (b_ih + b_hh).reshape(1, 4 * hidden_size),  # combined bias
        })
    k_fc = 1.0 / np.sqrt(hidden_size)
    key, k1, k2 = jax.random.split(key, 3)
    params["fc_w"] = jax.random.uniform(k1, (output_size, hidden_size), jnp.float32, -k_fc, k_fc)
    params["fc_b"] = jax.random.uniform(k2, (1, output_size), jnp.float32, -k_fc, k_fc)
    return params


def reference_forward(x, params):
    """Pure-JAX reference mirroring torch.nn.LSTM(batch_first=True) + Linear."""
    x_btd = jnp.transpose(x, (0, 2, 1))   # (B, T, D)
    B, T, _ = x_btd.shape
    inp = x_btd
    for layer in params["lstm"]:
        H = layer["w_hh"].shape[1]
        h = jnp.zeros((B, H), jnp.float32)
        c = jnp.zeros((B, H), jnp.float32)
        outs = []
        for t in range(T):
            gates = inp[:, t] @ layer["w_ih"].T + h @ layer["w_hh"].T + layer["b"][0]
            i_g = jax.nn.sigmoid(gates[:, :H])
            f_g = jax.nn.sigmoid(gates[:, H:2 * H])
            g_g = jnp.tanh(gates[:, 2 * H:3 * H])
            o_g = jax.nn.sigmoid(gates[:, 3 * H:])
            c = f_g * c + i_g * g_g
            h = o_g * jnp.tanh(c)
            outs.append(h)
        inp = jnp.stack(outs, axis=1)
    return inp[:, -1] @ params["fc_w"].T + params["fc_b"][0]


# ---------------------------------------------------------------------------

if __name__ == "__main__":
    B, INPUT_DIM, SEQ_LEN = 2, 4, 16
    HIDDEN, OUTPUT, NUM_LAYERS = 32, 1, 2

    key = jax.random.PRNGKey(0)
    key, kx = jax.random.split(key)
    x = jax.random.normal(kx, (B, INPUT_DIM, SEQ_LEN), jnp.float32)   # PyTorch (N, C, L)

    params = init_params(key, INPUT_DIM, HIDDEN, OUTPUT, NUM_LAYERS)
    packed = pack_params(params)   # one-time weight re-layout / block packing, outside the kernel

    out = lstm_regression_forward(x, packed)
    out = jax.block_until_ready(out)
    assert out.shape == (B, OUTPUT), out.shape

    ref = jax.block_until_ready(reference_forward(x, params))
    np.testing.assert_allclose(np.asarray(out), np.asarray(ref), rtol=2e-3, atol=2e-3)

    print("KERNEL_OK")
</pallas_src>

<mosaic_0001>
module attributes {stable_mosaic.version = 11 : i64} {
  func.func @kernel(%arg0: memref<32x4xf32, #tpu.memory_space<vmem>>, %arg1: memref<4x128xf32, #tpu.memory_space<vmem>>, %arg2: memref<64x256xf32, #tpu.memory_space<vmem>>, %arg3: memref<1x256xf32, #tpu.memory_space<vmem>>, %arg4: memref<1x32xf32, #tpu.memory_space<vmem>>, %arg5: memref<1x1xf32, #tpu.memory_space<vmem>>, %arg6: memref<2x1xf32, #tpu.memory_space<vmem>>) attributes {dimension_semantics = [], scalar_prefetch = 0 : i64, scratch_operands = 0 : i64, tpu.core_type = #tpu.core_type<tc>} {
    %c0 = arith.constant 0 : index
    %c0_0 = arith.constant 0 : index
    %0 = vector.load %arg2[%c0, %c0_0] : memref<64x256xf32, #tpu.memory_space<vmem>>, vector<64x256xf32>
    %c0_1 = arith.constant 0 : index
    %c0_2 = arith.constant 0 : index
    %1 = vector.load %arg3[%c0_1, %c0_2] : memref<1x256xf32, #tpu.memory_space<vmem>>, vector<1x256xf32>
    %2 = vector.shape_cast %1 : vector<1x256xf32> to vector<1x256xf32>
    %3 = vector.broadcast %2 : vector<1x256xf32> to vector<2x256xf32>
    %c0_3 = arith.constant 0 : index
    %c0_4 = arith.constant 0 : index
    %4 = vector.load %arg0[%c0_3, %c0_4] : memref<32x4xf32, #tpu.memory_space<vmem>>, vector<32x4xf32>
    %c0_5 = arith.constant 0 : index
    %c0_6 = arith.constant 0 : index
    %5 = vector.load %arg1[%c0_5, %c0_6] : memref<4x128xf32, #tpu.memory_space<vmem>>, vector<4x128xf32>
    %cst = arith.constant dense<0.000000e+00> : vector<32x128xf32>
    %6 = tpu.matmul %4, %5, %cst {dimension_numbers = #tpu.dot_dimension_numbers<[1], [0], [0], [1], [0, 0, 1, 1], [], []>} : vector<32x4xf32>, vector<4x128xf32>, vector<32x128xf32> -> vector<32x128xf32>
    %7 = vector.extract_strided_slice %6 {offsets = [0, 0], sizes = [2, 128], strides = [1, 1]} : vector<32x128xf32> to vector<2x128xf32>
    %8 = vector.extract_strided_slice %6 {offsets = [2, 0], sizes = [2, 128], strides = [1, 1]} : vector<32x128xf32> to vector<2x128xf32>
    %9 = vector.extract_strided_slice %6 {offsets = [4, 0], sizes = [2, 128], strides = [1, 1]} : vector<32x128xf32> to vector<2x128xf32>
    %10 = vector.extract_strided_slice %6 {offsets = [6, 0], sizes = [2, 128], strides = [1, 1]} : vector<32x128xf32> to vector<2x128xf32>
    %11 = vector.extract_strided_slice %6 {offsets = [8, 0], sizes = [2, 128], strides = [1, 1]} : vector<32x128xf32> to vector<2x128xf32>
    %12 = vector.extract_strided_slice %6 {offsets = [10, 0], sizes = [2, 128], strides = [1, 1]} : vector<32x128xf32> to vector<2x128xf32>
    %13 = vector.extract_strided_slice %6 {offsets = [12, 0], sizes = [2, 128], strides = [1, 1]} : vector<32x128xf32> to vector<2x128xf32>
    %14 = vector.extract_strided_slice %6 {offsets = [14, 0], sizes = [2, 128], strides = [1, 1]} : vector<32x128xf32> to vector<2x128xf32>
    %15 = vector.extract_strided_slice %6 {offsets = [16, 0], sizes = [2, 128], strides = [1, 1]} : vector<32x128xf32> to vector<2x128xf32>
    %16 = vector.extract_strided_slice %6 {offsets = [18, 0], sizes = [2, 128], strides = [1, 1]} : vector<32x128xf32> to vector<2x128xf32>
    %17 = vector.extract_strided_slice %6 {offsets = [20, 0], sizes = [2, 128], strides = [1, 1]} : vector<32x128xf32> to vector<2x128xf32>
    %18 = vector.extract_strided_slice %6 {offsets = [22, 0], sizes = [2, 128], strides = [1, 1]} : vector<32x128xf32> to vector<2x128xf32>
    %19 = vector.extract_strided_slice %6 {offsets = [24, 0], sizes = [2, 128], strides = [1, 1]} : vector<32x128xf32> to vector<2x128xf32>
    %20 = vector.extract_strided_slice %6 {offsets = [26, 0], sizes = [2, 128], strides = [1, 1]} : vector<32x128xf32> to vector<2x128xf32>
    %21 = vector.extract_strided_slice %6 {offsets = [28, 0], sizes = [2, 128], strides = [1, 1]} : vector<32x128xf32> to vector<2x128xf32>
    %22 = vector.extract_strided_slice %6 {offsets = [30, 0], sizes = [2, 128], strides = [1, 1]} : vector<32x128xf32> to vector<2x128xf32>
    %23 = tpu.iota {dimensions = array<i32: 1>} : vector<2x128xi32>
    %c64_i32 = arith.constant 64 : i32
    %24 = vector.broadcast %c64_i32 : i32 to vector<2x128xi32>
    %25 = arith.cmpi sge, %23, %24 : vector<2x128xi32>
    %c96_i32 = arith.constant 96 : i32
    %26 = vector.broadcast %c96_i32 : i32 to vector<2x128xi32>
    %27 = arith.cmpi slt, %23, %26 : vector<2x128xi32>
    %28 = arith.andi %25, %27 : vector<2x128xi1>
    %cst_7 = arith.constant 1.000000e+00 : f32
    %cst_8 = arith.constant 5.000000e-01 : f32
    %29 = vector.broadcast %cst_7 : f32 to vector<2x128xf32>
    %30 = vector.broadcast %cst_8 : f32 to vector<2x128xf32>
    %31 = arith.select %28, %29, %30 : vector<2x128xi1>, vector<2x128xf32>
    %cst_9 = arith.constant 0.000000e+00 : f32
    %cst_10 = arith.constant 5.000000e-01 : f32
    %32 = vector.broadcast %cst_9 : f32 to vector<2x128xf32>
    %33 = vector.broadcast %cst_10 : f32 to vector<2x128xf32>
    %34 = arith.select %28, %32, %33 : vector<2x128xi1>, vector<2x128xf32>
    %cst_11 = arith.constant 0.000000e+00 : f32
    %35 = vector.broadcast %cst_11 : f32 to vector<2x32xf32>
    %cst_12 = arith.constant 0.000000e+00 : f32
    %36 = vector.broadcast %cst_12 : f32 to vector<2x32xf32>
    %cst_13 = arith.constant 0.000000e+00 : f32
    %37 = vector.broadcast %cst_13 : f32 to vector<2x32xf32>
    %38 = vector.extract_strided_slice %3 {offsets = [0, 0], sizes = [2, 128], strides = [1, 1]} : vector<2x256xf32> to vector<2x128xf32>
    %39 = arith.addf %38, %7 : vector<2x128xf32>
    %40 = math.tanh %39 : vector<2x128xf32>
    %41 = arith.mulf %40, %31 : vector<2x128xf32>
    %42 = arith.addf %41, %34 : vector<2x128xf32>
    %43 = vector.extract_strided_slice %42 {offsets = [0, 0], sizes = [2, 32], strides = [1, 1]} : vector<2x128xf32> to vector<2x32xf32>
    %44 = vector.extract_strided_slice %42 {offsets = [0, 32], sizes = [2, 32], strides = [1, 1]} : vector<2x128xf32> to vector<2x32xf32>
    %45 = vector.extract_strided_slice %42 {offsets = [0, 64], sizes = [2, 32], strides = [1, 1]} : vector<2x128xf32> to vector<2x32xf32>
    %46 = vector.extract_strided_slice %42 {offsets = [0, 96], sizes = [2, 32], strides = [1, 1]} : vector<2x128xf32> to vector<2x32xf32>
    %47 = arith.mulf %44, %36 : vector<2x32xf32>
    %48 = arith.mulf %43, %45 : vector<2x32xf32>
    %49 = arith.addf %47, %48 : vector<2x32xf32>
    %50 = math.tanh %49 : vector<2x32xf32>
    %51 = arith.mulf %46, %50 : vector<2x32xf32>
    %52 = tpu.concatenate %51, %35 in 1 : vector<2x32xf32>, vector<2x32xf32> -> vector<2x64xf32>
    %cst_14 = arith.constant dense<0.000000e+00> : vector<2x256xf32>
    %53 = tpu.matmul %52, %0, %cst_14 {dimension_numbers = #tpu.dot_dimension_numbers<[1], [0], [0], [1], [0, 0, 1, 1], [], []>} : vector<2x64xf32>, vector<64x256xf32>, vector<2x256xf32> -> vector<2x256xf32>
    %54 = arith.addf %53, %3 : vector<2x256xf32>
    %55 = vector.extract_strided_slice %54 {offsets = [0, 0], sizes = [2, 128], strides = [1, 1]} : vector<2x256xf32> to vector<2x128xf32>
    %56 = arith.addf %55, %8 : vector<2x128xf32>
    %57 = math.tanh %56 : vector<2x128xf32>
    %58 = arith.mulf %57, %31 : vector<2x128xf32>
    %59 = arith.addf %58, %34 : vector<2x128xf32>
    %60 = vector.extract_strided_slice %59 {offsets = [0, 0], sizes = [2, 32], strides = [1, 1]} : vector<2x128xf32> to vector<2x32xf32>
    %61 = vector.extract_strided_slice %59 {offsets = [0, 32], sizes = [2, 32], strides = [1, 1]} : vector<2x128xf32> to vector<2x32xf32>
    %62 = vector.extract_strided_slice %59 {offsets = [0, 64], sizes = [2, 32], strides = [1, 1]} : vector<2x128xf32> to vector<2x32xf32>
    %63 = vector.extract_strided_slice %59 {offsets = [0, 96], sizes = [2, 32], strides = [1, 1]} : vector<2x128xf32> to vector<2x32xf32>
    %64 = arith.mulf %61, %49 : vector<2x32xf32>
    %65 = arith.mulf %60, %62 : vector<2x32xf32>
    %66 = arith.addf %64, %65 : vector<2x32xf32>
    %67 = math.tanh %66 : vector<2x32xf32>
    %68 = arith.mulf %63, %67 : vector<2x32xf32>
    %69 = vector.extract_strided_slice %54 {offsets = [0, 128], sizes = [2, 128], strides = [1, 1]} : vector<2x256xf32> to vector<2x128xf32>
    %70 = math.tanh %69 : vector<2x128xf32>
    %71 = arith.mulf %70, %31 : vector<2x128xf32>
    %72 = arith.addf %71, %34 : vector<2x128xf32>
    %73 = vector.extract_strided_slice %72 {offsets = [0, 0], sizes = [2, 32], strides = [1, 1]} : vector<2x128xf32> to vector<2x32xf32>
    %74 = vector.extract_strided_slice %72 {offsets = [0, 32], sizes = [2, 32], strides = [1, 1]} : vector<2x128xf32> to vector<2x32xf32>
    %75 = vector.extract_strided_slice %72 {offsets = [0, 64], sizes = [2, 32], strides = [1, 1]} : vector<2x128xf32> to vector<2x32xf32>
    %76 = vector.extract_strided_slice %72 {offsets = [0, 96], sizes = [2, 32], strides = [1, 1]} : vector<2x128xf32> to vector<2x32xf32>
    %77 = arith.mulf %74, %37 : vector<2x32xf32>
    %78 = arith.mulf %73, %75 : vector<2x32xf32>
    %79 = arith.addf %77, %78 : vector<2x32xf32>
    %80 = math.tanh %79 : vector<2x32xf32>
    %81 = arith.mulf %76, %80 : vector<2x32xf32>
    %82 = tpu.concatenate %68, %81 in 1 : vector<2x32xf32>, vector<2x32xf32> -> vector<2x64xf32>
    %cst_15 = arith.constant dense<0.000000e+00> : vector<2x256xf32>
    %83 = tpu.matmul %82, %0, %cst_15 {dimension_numbers = #tpu.dot_dimension_numbers<[1], [0], [0], [1], [0, 0, 1, 1], [], []>} : vector<2x64xf32>, vector<64x256xf32>, vector<2x256xf32> -> vector<2x256xf32>
    %84 = arith.addf %83, %3 : vector<2x256xf32>
    %85 = vector.extract_strided_slice %84 {offsets = [0, 0], sizes = [2, 128], strides = [1, 1]} : vector<2x256xf32> to vector<2x128xf32>
    %86 = arith.addf %85, %9 : vector<2x128xf32>
    %87 = math.tanh %86 : vector<2x128xf32>
    %88 = arith.mulf %87, %31 : vector<2x128xf32>
    %89 = arith.addf %88, %34 : vector<2x128xf32>
    %90 = vector.extract_strided_slice %89 {offsets = [0, 0], sizes = [2, 32], strides = [1, 1]} : vector<2x128xf32> to vector<2x32xf32>
    %91 = vector.extract_strided_slice %89 {offsets = [0, 32], sizes = [2, 32], strides = [1, 1]} : vector<2x128xf32> to vector<2x32xf32>
    %92 = vector.extract_strided_slice %89 {offsets = [0, 64], sizes = [2, 32], strides = [1, 1]} : vector<2x128xf32> to vector<2x32xf32>
    %93 = vector.extract_strided_slice %89 {offsets = [0, 96], sizes = [2, 32], strides = [1, 1]} : vector<2x128xf32> to vector<2x32xf32>
    %94 = arith.mulf %91, %66 : vector<2x32xf32>
    %95 = arith.mulf %90, %92 : vector<2x32xf32>
    %96 = arith.addf %94, %95 : vector<2x32xf32>
    %97 = math.tanh %96 : vector<2x32xf32>
    %98 = arith.mulf %93, %97 : vector<2x32xf32>
    %99 = vector.extract_strided_slice %84 {offsets = [0, 128], sizes = [2, 128], strides = [1, 1]} : vector<2x256xf32> to vector<2x128xf32>
    %100 = math.tanh %99 : vector<2x128xf32>
    %101 = arith.mulf %100, %31 : vector<2x128xf32>
    %102 = arith.addf %101, %34 : vector<2x128xf32>
    %103 = vector.extract_strided_slice %102 {offsets = [0, 0], sizes = [2, 32], strides = [1, 1]} : vector<2x128xf32> to vector<2x32xf32>
    %104 = vector.extract_strided_slice %102 {offsets = [0, 32], sizes = [2, 32], strides = [1, 1]} : vector<2x128xf32> to vector<2x32xf32>
    %105 = vector.extract_strided_slice %102 {offsets = [0, 64], sizes = [2, 32], strides = [1, 1]} : vector<2x128xf32> to vector<2x32xf32>
    %106 = vector.extract_strided_slice %102 {offsets = [0, 96], sizes = [2, 32], strides = [1, 1]} : vector<2x128xf32> to vector<2x32xf32>
    %107 = arith.mulf %104, %79 : vector<2x32xf32>
    %108 = arith.mulf %103, %105 : vector<2x32xf32>
    %109 = arith.addf %107, %108 : vector<2x32xf32>
    %110 = math.tanh %109 : vector<2x32xf32>
    %111 = arith.mulf %106, %110 : vector<2x32xf32>
    %112 = tpu.concatenate %98, %111 in 1 : vector<2x32xf32>, vector<2x32xf32> -> vector<2x64xf32>
    %cst_16 = arith.constant dense<0.000000e+00> : vector<2x256xf32>
    %113 = tpu.matmul %112, %0, %cst_16 {dimension_numbers = #tpu.dot_dimension_numbers<[1], [0], [0], [1], [0, 0, 1, 1], [], []>} : vector<2x64xf32>, vector<64x256xf32>, vector<2x256xf32> -> vector<2x256xf32>
    %114 = arith.addf %113, %3 : vector<2x256xf32>
    %115 = vector.extract_strided_slice %114 {offsets = [0, 0], sizes = [2, 128], strides = [1, 1]} : vector<2x256xf32> to vector<2x128xf32>
    %116 = arith.addf %115, %10 : vector<2x128xf32>
    %117 = math.tanh %116 : vector<2x128xf32>
    %118 = arith.mulf %117, %31 : vector<2x128xf32>
    %119 = arith.addf %118, %34 : vector<2x128xf32>
    %120 = vector.extract_strided_slice %119 {offsets = [0, 0], sizes = [2, 32], strides = [1, 1]} : vector<2x128xf32> to vector<2x32xf32>
    %121 = vector.extract_strided_slice %119 {offsets = [0, 32], sizes = [2, 32], strides = [1, 1]} : vector<2x128xf32> to vector<2x32xf32>
    %122 = vector.extract_strided_slice %119 {offsets = [0, 64], sizes = [2, 32], strides = [1, 1]} : vector<2x128xf32> to vector<2x32xf32>
    %123 = vector.extract_strided_slice %119 {offsets = [0, 96], sizes = [2, 32], strides = [1, 1]} : vector<2x128xf32> to vector<2x32xf32>
    %124 = arith.mulf %121, %96 : vector<2x32xf32>
    %125 = arith.mulf %120, %122 : vector<2x32xf32>
    %126 = arith.addf %124, %125 : vector<2x32xf32>
    %127 = math.tanh %126 : vector<2x32xf32>
    %128 = arith.mulf %123, %127 : vector<2x32xf32>
    %129 = vector.extract_strided_slice %114 {offsets = [0, 128], sizes = [2, 128], strides = [1, 1]} : vector<2x256xf32> to vector<2x128xf32>
    %130 = math.tanh %129 : vector<2x128xf32>
    %131 = arith.mulf %130, %31 : vector<2x128xf32>
    %132 = arith.addf %131, %34 : vector<2x128xf32>
    %133 = vector.extract_strided_slice %132 {offsets = [0, 0], sizes = [2, 32], strides = [1, 1]} : vector<2x128xf32> to vector<2x32xf32>
    %134 = vector.extract_strided_slice %132 {offsets = [0, 32], sizes = [2, 32], strides = [1, 1]} : vector<2x128xf32> to vector<2x32xf32>
    %135 = vector.extract_strided_slice %132 {offsets = [0, 64], sizes = [2, 32], strides = [1, 1]} : vector<2x128xf32> to vector<2x32xf32>
    %136 = vector.extract_strided_slice %132 {offsets = [0, 96], sizes = [2, 32], strides = [1, 1]} : vector<2x128xf32> to vector<2x32xf32>
    %137 = arith.mulf %134, %109 : vector<2x32xf32>
    %138 = arith.mulf %133, %135 : vector<2x32xf32>
    %139 = arith.addf %137, %138 : vector<2x32xf32>
    %140 = math.tanh %139 : vector<2x32xf32>
    %141 = arith.mulf %136, %140 : vector<2x32xf32>
    %142 = tpu.concatenate %128, %141 in 1 : vector<2x32xf32>, vector<2x32xf32> -> vector<2x64xf32>
    %cst_17 = arith.constant dense<0.000000e+00> : vector<2x256xf32>
    %143 = tpu.matmul %142, %0, %cst_17 {dimension_numbers = #tpu.dot_dimension_numbers<[1], [0], [0], [1], [0, 0, 1, 1], [], []>} : vector<2x64xf32>, vector<64x256xf32>, vector<2x256xf32> -> vector<2x256xf32>
    %144 = arith.addf %143, %3 : vector<2x256xf32>
    %145 = vector.extract_strided_slice %144 {offsets = [0, 0], sizes = [2, 128], strides = [1, 1]} : vector<2x256xf32> to vector<2x128xf32>
    %146 = arith.addf %145, %11 : vector<2x128xf32>
    %147 = math.tanh %146 : vector<2x128xf32>
    %148 = arith.mulf %147, %31 : vector<2x128xf32>
    %149 = arith.addf %148, %34 : vector<2x128xf32>
    %150 = vector.extract_strided_slice %149 {offsets = [0, 0], sizes = [2, 32], strides = [1, 1]} : vector<2x128xf32> to vector<2x32xf32>
    %151 = vector.extract_strided_slice %149 {offsets = [0, 32], sizes = [2, 32], strides = [1, 1]} : vector<2x128xf32> to vector<2x32xf32>
    %152 = vector.extract_strided_slice %149 {offsets = [0, 64], sizes = [2, 32], strides = [1, 1]} : vector<2x128xf32> to vector<2x32xf32>
    %153 = vector.extract_strided_slice %149 {offsets = [0, 96], sizes = [2, 32], strides = [1, 1]} : vector<2x128xf32> to vector<2x32xf32>
    %154 = arith.mulf %151, %126 : vector<2x32xf32>
    %155 = arith.mulf %150, %152 : vector<2x32xf32>
    %156 = arith.addf %154, %155 : vector<2x32xf32>
    %157 = math.tanh %156 : vector<2x32xf32>
    %158 = arith.mulf %153, %157 : vector<2x32xf32>
    %159 = vector.extract_strided_slice %144 {offsets = [0, 128], sizes = [2, 128], strides = [1, 1]} : vector<2x256xf32> to vector<2x128xf32>
    %160 = math.tanh %159 : vector<2x128xf32>
    %161 = arith.mulf %160, %31 : vector<2x128xf32>
    %162 = arith.addf %161, %34 : vector<2x128xf32>
    %163 = vector.extract_strided_slice %162 {offsets = [0, 0], sizes = [2, 32], strides = [1, 1]} : vector<2x128xf32> to vector<2x32xf32>
    %164 = vector.extract_strided_slice %162 {offsets = [0, 32], sizes = [2, 32], strides = [1, 1]} : vector<2x128xf32> to vector<2x32xf32>
    %165 = vector.extract_strided_slice %162 {offsets = [0, 64], sizes = [2, 32], strides = [1, 1]} : vector<2x128xf32> to vector<2x32xf32>
    %166 = vector.extract_strided_slice %162 {offsets = [0, 96], sizes = [2, 32], strides = [1, 1]} : vector<2x128xf32> to vector<2x32xf32>
    %167 = arith.mulf %164, %139 : vector<2x32xf32>
    %168 = arith.mulf %163, %165 : vector<2x32xf32>
    %169 = arith.addf %167, %168 : vector<2x32xf32>
    %170 = math.tanh %169 : vector<2x32xf32>
    %171 = arith.mulf %166, %170 : vector<2x32xf32>
    %172 = tpu.concatenate %158, %171 in 1 : vector<2x32xf32>, vector<2x32xf32> -> vector<2x64xf32>
    %cst_18 = arith.constant dense<0.000000e+00> : vector<2x256xf32>
    %173 = tpu.matmul %172, %0, %cst_18 {dimension_numbers = #tpu.dot_dimension_numbers<[1], [0], [0], [1], [0, 0, 1, 1], [], []>} : vector<2x64xf32>, vector<64x256xf32>, vector<2x256xf32> -> vector<2x256xf32>
    %174 = arith.addf %173, %3 : vector<2x256xf32>
    %175 = vector.extract_strided_slice %174 {offsets = [0, 0], sizes = [2, 128], strides = [1, 1]} : vector<2x256xf32> to vector<2x128xf32>
    %176 = arith.addf %175, %12 : vector<2x128xf32>
    %177 = math.tanh %176 : vector<2x128xf32>
    %178 = arith.mulf %177, %31 : vector<2x128xf32>
    %179 = arith.addf %178, %34 : vector<2x128xf32>
    %180 = vector.extract_strided_slice %179 {offsets = [0, 0], sizes = [2, 32], strides = [1, 1]} : vector<2x128xf32> to vector<2x32xf32>
    %181 = vector.extract_strided_slice %179 {offsets = [0, 32], sizes = [2, 32], strides = [1, 1]} : vector<2x128xf32> to vector<2x32xf32>
    %182 = vector.extract_strided_slice %179 {offsets = [0, 64], sizes = [2, 32], strides = [1, 1]} : vector<2x128xf32> to vector<2x32xf32>
    %183 = vector.extract_strided_slice %179 {offsets = [0, 96], sizes = [2, 32], strides = [1, 1]} : vector<2x128xf32> to vector<2x32xf32>
    %184 = arith.mulf %181, %156 : vector<2x32xf32>
    %185 = arith.mulf %180, %182 : vector<2x32xf32>
    %186 = arith.addf %184, %185 : vector<2x32xf32>
    %187 = math.tanh %186 : vector<2x32xf32>
    %188 = arith.mulf %183, %187 : vector<2x32xf32>
    %189 = vector.extract_strided_slice %174 {offsets = [0, 128], sizes = [2, 128], strides = [1, 1]} : vector<2x256xf32> to vector<2x128xf32>
    %190 = math.tanh %189 : vector<2x128xf32>
    %191 = arith.mulf %190, %31 : vector<2x128xf32>
    %192 = arith.addf %191, %34 : vector<2x128xf32>
    %193 = vector.extract_strided_slice %192 {offsets = [0, 0], sizes = [2, 32], strides = [1, 1]} : vector<2x128xf32> to vector<2x32xf32>
    %194 = vector.extract_strided_slice %192 {offsets = [0, 32], sizes = [2, 32], strides = [1, 1]} : vector<2x128xf32> to vector<2x32xf32>
    %195 = vector.extract_strided_slice %192 {offsets = [0, 64], sizes = [2, 32], strides = [1, 1]} : vector<2x128xf32> to vector<2x32xf32>
    %196 = vector.extract_strided_slice %192 {offsets = [0, 96], sizes = [2, 32], strides = [1, 1]} : vector<2x128xf32> to vector<2x32xf32>
    %197 = arith.mulf %194, %169 : vector<2x32xf32>
    %198 = arith.mulf %193, %195 : vector<2x32xf32>
    %199 = arith.addf %197, %198 : vector<2x32xf32>
    %200 = math.tanh %199 : vector<2x32xf32>
    %201 = arith.mulf %196, %200 : vector<2x32xf32>
    %202 = tpu.concatenate %188, %201 in 1 : vector<2x32xf32>, vector<2x32xf32> -> vector<2x64xf32>
    %cst_19 = arith.constant dense<0.000000e+00> : vector<2x256xf32>
    %203 = tpu.matmul %202, %0, %cst_19 {dimension_numbers = #tpu.dot_dimension_numbers<[1], [0], [0], [1], [0, 0, 1, 1], [], []>} : vector<2x64xf32>, vector<64x256xf32>, vector<2x256xf32> -> vector<2x256xf32>
    %204 = arith.addf %203, %3 : vector<2x256xf32>
    %205 = vector.extract_strided_slice %204 {offsets = [0, 0], sizes = [2, 128], strides = [1, 1]} : vector<2x256xf32> to vector<2x128xf32>
    %206 = arith.addf %205, %13 : vector<2x128xf32>
    %207 = math.tanh %206 : vector<2x128xf32>
    %208 = arith.mulf %207, %31 : vector<2x128xf32>
    %209 = arith.addf %208, %34 : vector<2x128xf32>
    %210 = vector.extract_strided_slice %209 {offsets = [0, 0], sizes = [2, 32], strides = [1, 1]} : vector<2x128xf32> to vector<2x32xf32>
    %211 = vector.extract_strided_slice %209 {offsets = [0, 32], sizes = [2, 32], strides = [1, 1]} : vector<2x128xf32> to vector<2x32xf32>
    %212 = vector.extract_strided_slice %209 {offsets = [0, 64], sizes = [2, 32], strides = [1, 1]} : vector<2x128xf32> to vector<2x32xf32>
    %213 = vector.extract_strided_slice %209 {offsets = [0, 96], sizes = [2, 32], strides = [1, 1]} : vector<2x128xf32> to vector<2x32xf32>
    %214 = arith.mulf %211, %186 : vector<2x32xf32>
    %215 = arith.mulf %210, %212 : vector<2x32xf32>
    %216 = arith.addf %214, %215 : vector<2x32xf32>
    %217 = math.tanh %216 : vector<2x32xf32>
    %218 = arith.mulf %213, %217 : vector<2x32xf32>
    %219 = vector.extract_strided_slice %204 {offsets = [0, 128], sizes = [2, 128], strides = [1, 1]} : vector<2x256xf32> to vector<2x128xf32>
    %220 = math.tanh %219 : vector<2x128xf32>
    %221 = arith.mulf %220, %31 : vector<2x128xf32>
    %222 = arith.addf %221, %34 : vector<2x128xf32>
    %223 = vector.extract_strided_slice %222 {offsets = [0, 0], sizes = [2, 32], strides = [1, 1]} : vector<2x128xf32> to vector<2x32xf32>
    %224 = vector.extract_strided_slice %222 {offsets = [0, 32], sizes = [2, 32], strides = [1, 1]} : vector<2x128xf32> to vector<2x32xf32>
    %225 = vector.extract_strided_slice %222 {offsets = [0, 64], sizes = [2, 32], strides = [1, 1]} : vector<2x128xf32> to vector<2x32xf32>
    %226 = vector.extract_strided_slice %222 {offsets = [0, 96], sizes = [2, 32], strides = [1, 1]} : vector<2x128xf32> to vector<2x32xf32>
    %227 = arith.mulf %224, %199 : vector<2x32xf32>
    %228 = arith.mulf %223, %225 : vector<2x32xf32>
    %229 = arith.addf %227, %228 : vector<2x32xf32>
    %230 = math.tanh %229 : vector<2x32xf32>
    %231 = arith.mulf %226, %230 : vector<2x32xf32>
    %232 = tpu.concatenate %218, %231 in 1 : vector<2x32xf32>, vector<2x32xf32> -> vector<2x64xf32>
    %cst_20 = arith.constant dense<0.000000e+00> : vector<2x256xf32>
    %233 = tpu.matmul %232, %0, %cst_20 {dimension_numbers = #tpu.dot_dimension_numbers<[1], [0], [0], [1], [0, 0, 1, 1], [], []>} : vector<2x64xf32>, vector<64x256xf32>, vector<2x256xf32> -> vector<2x256xf32>
    %234 = arith.addf %233, %3 : vector<2x256xf32>
    %235 = vector.extract_strided_slice %234 {offsets = [0, 0], sizes = [2, 128], strides = [1, 1]} : vector<2x256xf32> to vector<2x128xf32>
    %236 = arith.addf %235, %14 : vector<2x128xf32>
    %237 = math.tanh %236 : vector<2x128xf32>
    %238 = arith.mulf %237, %31 : vector<2x128xf32>
    %239 = arith.addf %238, %34 : vector<2x128xf32>
    %240 = vector.extract_strided_slice %239 {offsets = [0, 0], sizes = [2, 32], strides = [1, 1]} : vector<2x128xf32> to vector<2x32xf32>
    %241 = vector.extract_strided_slice %239 {offsets = [0, 32], sizes = [2, 32], strides = [1, 1]} : vector<2x128xf32> to vector<2x32xf32>
    %242 = vector.extract_strided_slice %239 {offsets = [0, 64], sizes = [2, 32], strides = [1, 1]} : vector<2x128xf32> to vector<2x32xf32>
    %243 = vector.extract_strided_slice %239 {offsets = [0, 96], sizes = [2, 32], strides = [1, 1]} : vector<2x128xf32> to vector<2x32xf32>
    %244 = arith.mulf %241, %216 : vector<2x32xf32>
    %245 = arith.mulf %240, %242 : vector<2x32xf32>
    %246 = arith.addf %244, %245 : vector<2x32xf32>
    %247 = math.tanh %246 : vector<2x32xf32>
    %248 = arith.mulf %243, %247 : vector<2x32xf32>
    %249 = vector.extract_strided_slice %234 {offsets = [0, 128], sizes = [2, 128], strides = [1, 1]} : vector<2x256xf32> to vector<2x128xf32>
    %250 = math.tanh %249 : vector<2x128xf32>
    %251 = arith.mulf %250, %31 : vector<2x128xf32>
    %252 = arith.addf %251, %34 : vector<2x128xf32>
    %253 = vector.extract_strided_slice %252 {offsets = [0, 0], sizes = [2, 32], strides = [1, 1]} : vector<2x128xf32> to vector<2x32xf32>
    %254 = vector.extract_strided_slice %252 {offsets = [0, 32], sizes = [2, 32], strides = [1, 1]} : vector<2x128xf32> to vector<2x32xf32>
    %255 = vector.extract_strided_slice %252 {offsets = [0, 64], sizes = [2, 32], strides = [1, 1]} : vector<2x128xf32> to vector<2x32xf32>
    %256 = vector.extract_strided_slice %252 {offsets = [0, 96], sizes = [2, 32], strides = [1, 1]} : vector<2x128xf32> to vector<2x32xf32>
    %257 = arith.mulf %254, %229 : vector<2x32xf32>
    %258 = arith.mulf %253, %255 : vector<2x32xf32>
    %259 = arith.addf %257, %258 : vector<2x32xf32>
    %260 = math.tanh %259 : vector<2x32xf32>
    %261 = arith.mulf %256, %260 : vector<2x32xf32>
    %262 = tpu.concatenate %248, %261 in 1 : vector<2x32xf32>, vector<2x32xf32> -> vector<2x64xf32>
    %cst_21 = arith.constant dense<0.000000e+00> : vector<2x256xf32>
    %263 = tpu.matmul %262, %0, %cst_21 {dimension_numbers = #tpu.dot_dimension_numbers<[1], [0], [0], [1], [0, 0, 1, 1], [], []>} : vector<2x64xf32>, vector<64x256xf32>, vector<2x256xf32> -> vector<2x256xf32>
    %264 = arith.addf %263, %3 : vector<2x256xf32>
    %265 = vector.extract_strided_slice %264 {offsets = [0, 0], sizes = [2, 128], strides = [1, 1]} : vector<2x256xf32> to vector<2x128xf32>
    %266 = arith.addf %265, %15 : vector<2x128xf32>
    %267 = math.tanh %266 : vector<2x128xf32>
    %268 = arith.mulf %267, %31 : vector<2x128xf32>
    %269 = arith.addf %268, %34 : vector<2x128xf32>
    %270 = vector.extract_strided_slice %269 {offsets = [0, 0], sizes = [2, 32], strides = [1, 1]} : vector<2x128xf32> to vector<2x32xf32>
    %271 = vector.extract_strided_slice %269 {offsets = [0, 32], sizes = [2, 32], strides = [1, 1]} : vector<2x128xf32> to vector<2x32xf32>
    %272 = vector.extract_strided_slice %269 {offsets = [0, 64], sizes = [2, 32], strides = [1, 1]} : vector<2x128xf32> to vector<2x32xf32>
    %273 = vector.extract_strided_slice %269 {offsets = [0, 96], sizes = [2, 32], strides = [1, 1]} : vector<2x128xf32> to vector<2x32xf32>
    %274 = arith.mulf %271, %246 : vector<2x32xf32>
    %275 = arith.mulf %270, %272 : vector<2x32xf32>
    %276 = arith.addf %274, %275 : vector<2x32xf32>
    %277 = math.tanh %276 : vector<2x32xf32>
    %278 = arith.mulf %273, %277 : vector<2x32xf32>
    %279 = vector.extract_strided_slice %264 {offsets = [0, 128], sizes = [2, 128], strides = [1, 1]} : vector<2x256xf32> to vector<2x128xf32>
    %280 = math.tanh %279 : vector<2x128xf32>
    %281 = arith.mulf %280, %31 : vector<2x128xf32>
    %282 = arith.addf %281, %34 : vector<2x128xf32>
    %283 = vector.extract_strided_slice %282 {offsets = [0, 0], sizes = [2, 32], strides = [1, 1]} : vector<2x128xf32> to vector<2x32xf32>
    %284 = vector.extract_strided_slice %282 {offsets = [0, 32], sizes = [2, 32], strides = [1, 1]} : vector<2x128xf32> to vector<2x32xf32>
    %285 = vector.extract_strided_slice %282 {offsets = [0, 64], sizes = [2, 32], strides = [1, 1]} : vector<2x128xf32> to vector<2x32xf32>
    %286 = vector.extract_strided_slice %282 {offsets = [0, 96], sizes = [2, 32], strides = [1, 1]} : vector<2x128xf32> to vector<2x32xf32>
    %287 = arith.mulf %284, %259 : vector<2x32xf32>
    %288 = arith.mulf %283, %285 : vector<2x32xf32>
    %289 = arith.addf %287, %288 : vector<2x32xf32>
    %290 = math.tanh %289 : vector<2x32xf32>
    %291 = arith.mulf %286, %290 : vector<2x32xf32>
    %292 = tpu.concatenate %278, %291 in 1 : vector<2x32xf32>, vector<2x32xf32> -> vector<2x64xf32>
    %cst_22 = arith.constant dense<0.000000e+00> : vector<2x256xf32>
    %293 = tpu.matmul %292, %0, %cst_22 {dimension_numbers = #tpu.dot_dimension_numbers<[1], [0], [0], [1], [0, 0, 1, 1], [], []>} : vector<2x64xf32>, vector<64x256xf32>, vector<2x256xf32> -> vector<2x256xf32>
    %294 = arith.addf %293, %3 : vector<2x256xf32>
    %295 = vector.extract_strided_slice %294 {offsets = [0, 0], sizes = [2, 128], strides = [1, 1]} : vector<2x256xf32> to vector<2x128xf32>
    %296 = arith.addf %295, %16 : vector<2x128xf32>
    %297 = math.tanh %296 : vector<2x128xf32>
    %298 = arith.mulf %297, %31 : vector<2x128xf32>
    %299 = arith.addf %298, %34 : vector<2x128xf32>
    %300 = vector.extract_strided_slice %299 {offsets = [0, 0], sizes = [2, 32], strides = [1, 1]} : vector<2x128xf32> to vector<2x32xf32>
    %301 = vector.extract_strided_slice %299 {offsets = [0, 32], sizes = [2, 32], strides = [1, 1]} : vector<2x128xf32> to vector<2x32xf32>
    %302 = vector.extract_strided_slice %299 {offsets = [0, 64], sizes = [2, 32], strides = [1, 1]} : vector<2x128xf32> to vector<2x32xf32>
    %303 = vector.extract_strided_slice %299 {offsets = [0, 96], sizes = [2, 32], strides = [1, 1]} : vector<2x128xf32> to vector<2x32xf32>
    %304 = arith.mulf %301, %276 : vector<2x32xf32>
    %305 = arith.mulf %300, %302 : vector<2x32xf32>
    %306 = arith.addf %304, %305 : vector<2x32xf32>
    %307 = math.tanh %306 : vector<2x32xf32>
    %308 = arith.mulf %303, %307 : vector<2x32xf32>
    %309 = vector.extract_strided_slice %294 {offsets = [0, 128], sizes = [2, 128], strides = [1, 1]} : vector<2x256xf32> to vector<2x128xf32>
    %310 = math.tanh %309 : vector<2x128xf32>
    %311 = arith.mulf %310, %31 : vector<2x128xf32>
    %312 = arith.addf %311, %34 : vector<2x128xf32>
    %313 = vector.extract_strided_slice %312 {offsets = [0, 0], sizes = [2, 32], strides = [1, 1]} : vector<2x128xf32> to vector<2x32xf32>
    %314 = vector.extract_strided_slice %312 {offsets = [0, 32], sizes = [2, 32], strides = [1, 1]} : vector<2x128xf32> to vector<2x32xf32>
    %315 = vector.extract_strided_slice %312 {offsets = [0, 64], sizes = [2, 32], strides = [1, 1]} : vector<2x128xf32> to vector<2x32xf32>
    %316 = vector.extract_strided_slice %312 {offsets = [0, 96], sizes = [2, 32], strides = [1, 1]} : vector<2x128xf32> to vector<2x32xf32>
    %317 = arith.mulf %314, %289 : vector<2x32xf32>
    %318 = arith.mulf %313, %315 : vector<2x32xf32>
    %319 = arith.addf %317, %318 : vector<2x32xf32>
    %320 = math.tanh %319 : vector<2x32xf32>
    %321 = arith.mulf %316, %320 : vector<2x32xf32>
    %322 = tpu.concatenate %308, %321 in 1 : vector<2x32xf32>, vector<2x32xf32> -> vector<2x64xf32>
    %cst_23 = arith.constant dense<0.000000e+00> : vector<2x256xf32>
    %323 = tpu.matmul %322, %0, %cst_23 {dimension_numbers = #tpu.dot_dimension_numbers<[1], [0], [0], [1], [0, 0, 1, 1], [], []>} : vector<2x64xf32>, vector<64x256xf32>, vector<2x256xf32> -> vector<2x256xf32>
    %324 = arith.addf %323, %3 : vector<2x256xf32>
    %325 = vector.extract_strided_slice %324 {offsets = [0, 0], sizes = [2, 128], strides = [1, 1]} : vector<2x256xf32> to vector<2x128xf32>
    %326 = arith.addf %325, %17 : vector<2x128xf32>
    %327 = math.tanh %326 : vector<2x128xf32>
    %328 = arith.mulf %327, %31 : vector<2x128xf32>
    %329 = arith.addf %328, %34 : vector<2x128xf32>
    %330 = vector.extract_strided_slice %329 {offsets = [0, 0], sizes = [2, 32], strides = [1, 1]} : vector<2x128xf32> to vector<2x32xf32>
    %331 = vector.extract_strided_slice %329 {offsets = [0, 32], sizes = [2, 32], strides = [1, 1]} : vector<2x128xf32> to vector<2x32xf32>
    %332 = vector.extract_strided_slice %329 {offsets = [0, 64], sizes = [2, 32], strides = [1, 1]} : vector<2x128xf32> to vector<2x32xf32>
    %333 = vector.extract_strided_slice %329 {offsets = [0, 96], sizes = [2, 32], strides = [1, 1]} : vector<2x128xf32> to vector<2x32xf32>
    %334 = arith.mulf %331, %306 : vector<2x32xf32>
    %335 = arith.mulf %330, %332 : vector<2x32xf32>
    %336 = arith.addf %334, %335 : vector<2x32xf32>
    %337 = math.tanh %336 : vector<2x32xf32>
    %338 = arith.mulf %333, %337 : vector<2x32xf32>
    %339 = vector.extract_strided_slice %324 {offsets = [0, 128], sizes = [2, 128], strides = [1, 1]} : vector<2x256xf32> to vector<2x128xf32>
    %340 = math.tanh %339 : vector<2x128xf32>
    %341 = arith.mulf %340, %31 : vector<2x128xf32>
    %342 = arith.addf %341, %34 : vector<2x128xf32>
    %343 = vector.extract_strided_slice %342 {offsets = [0, 0], sizes = [2, 32], strides = [1, 1]} : vector<2x128xf32> to vector<2x32xf32>
    %344 = vector.extract_strided_slice %342 {offsets = [0, 32], sizes = [2, 32], strides = [1, 1]} : vector<2x128xf32> to vector<2x32xf32>
    %345 = vector.extract_strided_slice %342 {offsets = [0, 64], sizes = [2, 32], strides = [1, 1]} : vector<2x128xf32> to vector<2x32xf32>
    %346 = vector.extract_strided_slice %342 {offsets = [0, 96], sizes = [2, 32], strides = [1, 1]} : vector<2x128xf32> to vector<2x32xf32>
    %347 = arith.mulf %344, %319 : vector<2x32xf32>
    %348 = arith.mulf %343, %345 : vector<2x32xf32>
    %349 = arith.addf %347, %348 : vector<2x32xf32>
    %350 = math.tanh %349 : vector<2x32xf32>
    %351 = arith.mulf %346, %350 : vector<2x32xf32>
    %352 = tpu.concatenate %338, %351 in 1 : vector<2x32xf32>, vector<2x32xf32> -> vector<2x64xf32>
    %cst_24 = arith.constant dense<0.000000e+00> : vector<2x256xf32>
    %353 = tpu.matmul %352, %0, %cst_24 {dimension_numbers = #tpu.dot_dimension_numbers<[1], [0], [0], [1], [0, 0, 1, 1], [], []>} : vector<2x64xf32>, vector<64x256xf32>, vector<2x256xf32> -> vector<2x256xf32>
    %354 = arith.addf %353, %3 : vector<2x256xf32>
    %355 = vector.extract_strided_slice %354 {offsets = [0, 0], sizes = [2, 128], strides = [1, 1]} : vector<2x256xf32> to vector<2x128xf32>
    %356 = arith.addf %355, %18 : vector<2x128xf32>
    %357 = math.tanh %356 : vector<2x128xf32>
    %358 = arith.mulf %357, %31 : vector<2x128xf32>
    %359 = arith.addf %358, %34 : vector<2x128xf32>
    %360 = vector.extract_strided_slice %359 {offsets = [0, 0], sizes = [2, 32], strides = [1, 1]} : vector<2x128xf32> to vector<2x32xf32>
    %361 = vector.extract_strided_slice %359 {offsets = [0, 32], sizes = [2, 32], strides = [1, 1]} : vector<2x128xf32> to vector<2x32xf32>
    %362 = vector.extract_strided_slice %359 {offsets = [0, 64], sizes = [2, 32], strides = [1, 1]} : vector<2x128xf32> to vector<2x32xf32>
    %363 = vector.extract_strided_slice %359 {offsets = [0, 96], sizes = [2, 32], strides = [1, 1]} : vector<2x128xf32> to vector<2x32xf32>
    %364 = arith.mulf %361, %336 : vector<2x32xf32>
    %365 = arith.mulf %360, %362 : vector<2x32xf32>
    %366 = arith.addf %364, %365 : vector<2x32xf32>
    %367 = math.tanh %366 : vector<2x32xf32>
    %368 = arith.mulf %363, %367 : vector<2x32xf32>
    %369 = vector.extract_strided_slice %354 {offsets = [0, 128], sizes = [2, 128], strides = [1, 1]} : vector<2x256xf32> to vector<2x128xf32>
    %370 = math.tanh %369 : vector<2x128xf32>
    %371 = arith.mulf %370, %31 : vector<2x128xf32>
    %372 = arith.addf %371, %34 : vector<2x128xf32>
    %373 = vector.extract_strided_slice %372 {offsets = [0, 0], sizes = [2, 32], strides = [1, 1]} : vector<2x128xf32> to vector<2x32xf32>
    %374 = vector.extract_strided_slice %372 {offsets = [0, 32], sizes = [2, 32], strides = [1, 1]} : vector<2x128xf32> to vector<2x32xf32>
    %375 = vector.extract_strided_slice %372 {offsets = [0, 64], sizes = [2, 32], strides = [1, 1]} : vector<2x128xf32> to vector<2x32xf32>
    %376 = vector.extract_strided_slice %372 {offsets = [0, 96], sizes = [2, 32], strides = [1, 1]} : vector<2x128xf32> to vector<2x32xf32>
    %377 = arith.mulf %374, %349 : vector<2x32xf32>
    %378 = arith.mulf %373, %375 : vector<2x32xf32>
    %379 = arith.addf %377, %378 : vector<2x32xf32>
    %380 = math.tanh %379 : vector<2x32xf32>
    %381 = arith.mulf %376, %380 : vector<2x32xf32>
    %382 = tpu.concatenate %368, %381 in 1 : vector<2x32xf32>, vector<2x32xf32> -> vector<2x64xf32>
    %cst_25 = arith.constant dense<0.000000e+00> : vector<2x256xf32>
    %383 = tpu.matmul %382, %0, %cst_25 {dimension_numbers = #tpu.dot_dimension_numbers<[1], [0], [0], [1], [0, 0, 1, 1], [], []>} : vector<2x64xf32>, vector<64x256xf32>, vector<2x256xf32> -> vector<2x256xf32>
    %384 = arith.addf %383, %3 : vector<2x256xf32>
    %385 = vector.extract_strided_slice %384 {offsets = [0, 0], sizes = [2, 128], strides = [1, 1]} : vector<2x256xf32> to vector<2x128xf32>
    %386 = arith.addf %385, %19 : vector<2x128xf32>
    %387 = math.tanh %386 : vector<2x128xf32>
    %388 = arith.mulf %387, %31 : vector<2x128xf32>
    %389 = arith.addf %388, %34 : vector<2x128xf32>
    %390 = vector.extract_strided_slice %389 {offsets = [0, 0], sizes = [2, 32], strides = [1, 1]} : vector<2x128xf32> to vector<2x32xf32>
    %391 = vector.extract_strided_slice %389 {offsets = [0, 32], sizes = [2, 32], strides = [1, 1]} : vector<2x128xf32> to vector<2x32xf32>
    %392 = vector.extract_strided_slice %389 {offsets = [0, 64], sizes = [2, 32], strides = [1, 1]} : vector<2x128xf32> to vector<2x32xf32>
    %393 = vector.extract_strided_slice %389 {offsets = [0, 96], sizes = [2, 32], strides = [1, 1]} : vector<2x128xf32> to vector<2x32xf32>
    %394 = arith.mulf %391, %366 : vector<2x32xf32>
    %395 = arith.mulf %390, %392 : vector<2x32xf32>
    %396 = arith.addf %394, %395 : vector<2x32xf32>
    %397 = math.tanh %396 : vector<2x32xf32>
    %398 = arith.mulf %393, %397 : vector<2x32xf32>
    %399 = vector.extract_strided_slice %384 {offsets = [0, 128], sizes = [2, 128], strides = [1, 1]} : vector<2x256xf32> to vector<2x128xf32>
    %400 = math.tanh %399 : vector<2x128xf32>
    %401 = arith.mulf %400, %31 : vector<2x128xf32>
    %402 = arith.addf %401, %34 : vector<2x128xf32>
    %403 = vector.extract_strided_slice %402 {offsets = [0, 0], sizes = [2, 32], strides = [1, 1]} : vector<2x128xf32> to vector<2x32xf32>
    %404 = vector.extract_strided_slice %402 {offsets = [0, 32], sizes = [2, 32], strides = [1, 1]} : vector<2x128xf32> to vector<2x32xf32>
    %405 = vector.extract_strided_slice %402 {offsets = [0, 64], sizes = [2, 32], strides = [1, 1]} : vector<2x128xf32> to vector<2x32xf32>
    %406 = vector.extract_strided_slice %402 {offsets = [0, 96], sizes = [2, 32], strides = [1, 1]} : vector<2x128xf32> to vector<2x32xf32>
    %407 = arith.mulf %404, %379 : vector<2x32xf32>
    %408 = arith.mulf %403, %405 : vector<2x32xf32>
    %409 = arith.addf %407, %408 : vector<2x32xf32>
    %410 = math.tanh %409 : vector<2x32xf32>
    %411 = arith.mulf %406, %410 : vector<2x32xf32>
    %412 = tpu.concatenate %398, %411 in 1 : vector<2x32xf32>, vector<2x32xf32> -> vector<2x64xf32>
    %cst_26 = arith.constant dense<0.000000e+00> : vector<2x256xf32>
    %413 = tpu.matmul %412, %0, %cst_26 {dimension_numbers = #tpu.dot_dimension_numbers<[1], [0], [0], [1], [0, 0, 1, 1], [], []>} : vector<2x64xf32>, vector<64x256xf32>, vector<2x256xf32> -> vector<2x256xf32>
    %414 = arith.addf %413, %3 : vector<2x256xf32>
    %415 = vector.extract_strided_slice %414 {offsets = [0, 0], sizes = [2, 128], strides = [1, 1]} : vector<2x256xf32> to vector<2x128xf32>
    %416 = arith.addf %415, %20 : vector<2x128xf32>
    %417 = math.tanh %416 : vector<2x128xf32>
    %418 = arith.mulf %417, %31 : vector<2x128xf32>
    %419 = arith.addf %418, %34 : vector<2x128xf32>
    %420 = vector.extract_strided_slice %419 {offsets = [0, 0], sizes = [2, 32], strides = [1, 1]} : vector<2x128xf32> to vector<2x32xf32>
    %421 = vector.extract_strided_slice %419 {offsets = [0, 32], sizes = [2, 32], strides = [1, 1]} : vector<2x128xf32> to vector<2x32xf32>
    %422 = vector.extract_strided_slice %419 {offsets = [0, 64], sizes = [2, 32], strides = [1, 1]} : vector<2x128xf32> to vector<2x32xf32>
    %423 = vector.extract_strided_slice %419 {offsets = [0, 96], sizes = [2, 32], strides = [1, 1]} : vector<2x128xf32> to vector<2x32xf32>
    %424 = arith.mulf %421, %396 : vector<2x32xf32>
    %425 = arith.mulf %420, %422 : vector<2x32xf32>
    %426 = arith.addf %424, %425 : vector<2x32xf32>
    %427 = math.tanh %426 : vector<2x32xf32>
    %428 = arith.mulf %423, %427 : vector<2x32xf32>
    %429 = vector.extract_strided_slice %414 {offsets = [0, 128], sizes = [2, 128], strides = [1, 1]} : vector<2x256xf32> to vector<2x128xf32>
    %430 = math.tanh %429 : vector<2x128xf32>
    %431 = arith.mulf %430, %31 : vector<2x128xf32>
    %432 = arith.addf %431, %34 : vector<2x128xf32>
    %433 = vector.extract_strided_slice %432 {offsets = [0, 0], sizes = [2, 32], strides = [1, 1]} : vector<2x128xf32> to vector<2x32xf32>
    %434 = vector.extract_strided_slice %432 {offsets = [0, 32], sizes = [2, 32], strides = [1, 1]} : vector<2x128xf32> to vector<2x32xf32>
    %435 = vector.extract_strided_slice %432 {offsets = [0, 64], sizes = [2, 32], strides = [1, 1]} : vector<2x128xf32> to vector<2x32xf32>
    %436 = vector.extract_strided_slice %432 {offsets = [0, 96], sizes = [2, 32], strides = [1, 1]} : vector<2x128xf32> to vector<2x32xf32>
    %437 = arith.mulf %434, %409 : vector<2x32xf32>
    %438 = arith.mulf %433, %435 : vector<2x32xf32>
    %439 = arith.addf %437, %438 : vector<2x32xf32>
    %440 = math.tanh %439 : vector<2x32xf32>
    %441 = arith.mulf %436, %440 : vector<2x32xf32>
    %442 = tpu.concatenate %428, %441 in 1 : vector<2x32xf32>, vector<2x32xf32> -> vector<2x64xf32>
    %cst_27 = arith.constant dense<0.000000e+00> : vector<2x256xf32>
    %443 = tpu.matmul %442, %0, %cst_27 {dimension_numbers = #tpu.dot_dimension_numbers<[1], [0], [0], [1], [0, 0, 1, 1], [], []>} : vector<2x64xf32>, vector<64x256xf32>, vector<2x256xf32> -> vector<2x256xf32>
    %444 = arith.addf %443, %3 : vector<2x256xf32>
    %445 = vector.extract_strided_slice %444 {offsets = [0, 0], sizes = [2, 128], strides = [1, 1]} : vector<2x256xf32> to vector<2x128xf32>
    %446 = arith.addf %445, %21 : vector<2x128xf32>
    %447 = math.tanh %446 : vector<2x128xf32>
    %448 = arith.mulf %447, %31 : vector<2x128xf32>
    %449 = arith.addf %448, %34 : vector<2x128xf32>
    %450 = vector.extract_strided_slice %449 {offsets = [0, 0], sizes = [2, 32], strides = [1, 1]} : vector<2x128xf32> to vector<2x32xf32>
    %451 = vector.extract_strided_slice %449 {offsets = [0, 32], sizes = [2, 32], strides = [1, 1]} : vector<2x128xf32> to vector<2x32xf32>
    %452 = vector.extract_strided_slice %449 {offsets = [0, 64], sizes = [2, 32], strides = [1, 1]} : vector<2x128xf32> to vector<2x32xf32>
    %453 = vector.extract_strided_slice %449 {offsets = [0, 96], sizes = [2, 32], strides = [1, 1]} : vector<2x128xf32> to vector<2x32xf32>
    %454 = arith.mulf %451, %426 : vector<2x32xf32>
    %455 = arith.mulf %450, %452 : vector<2x32xf32>
    %456 = arith.addf %454, %455 : vector<2x32xf32>
    %457 = math.tanh %456 : vector<2x32xf32>
    %458 = arith.mulf %453, %457 : vector<2x32xf32>
    %459 = vector.extract_strided_slice %444 {offsets = [0, 128], sizes = [2, 128], strides = [1, 1]} : vector<2x256xf32> to vector<2x128xf32>
    %460 = math.tanh %459 : vector<2x128xf32>
    %461 = arith.mulf %460, %31 : vector<2x128xf32>
    %462 = arith.addf %461, %34 : vector<2x128xf32>
    %463 = vector.extract_strided_slice %462 {offsets = [0, 0], sizes = [2, 32], strides = [1, 1]} : vector<2x128xf32> to vector<2x32xf32>
    %464 = vector.extract_strided_slice %462 {offsets = [0, 32], sizes = [2, 32], strides = [1, 1]} : vector<2x128xf32> to vector<2x32xf32>
    %465 = vector.extract_strided_slice %462 {offsets = [0, 64], sizes = [2, 32], strides = [1, 1]} : vector<2x128xf32> to vector<2x32xf32>
    %466 = vector.extract_strided_slice %462 {offsets = [0, 96], sizes = [2, 32], strides = [1, 1]} : vector<2x128xf32> to vector<2x32xf32>
    %467 = arith.mulf %464, %439 : vector<2x32xf32>
    %468 = arith.mulf %463, %465 : vector<2x32xf32>
    %469 = arith.addf %467, %468 : vector<2x32xf32>
    %470 = math.tanh %469 : vector<2x32xf32>
    %471 = arith.mulf %466, %470 : vector<2x32xf32>
    %472 = tpu.concatenate %458, %471 in 1 : vector<2x32xf32>, vector<2x32xf32> -> vector<2x64xf32>
    %cst_28 = arith.constant dense<0.000000e+00> : vector<2x256xf32>
    %473 = tpu.matmul %472, %0, %cst_28 {dimension_numbers = #tpu.dot_dimension_numbers<[1], [0], [0], [1], [0, 0, 1, 1], [], []>} : vector<2x64xf32>, vector<64x256xf32>, vector<2x256xf32> -> vector<2x256xf32>
    %474 = arith.addf %473, %3 : vector<2x256xf32>
    %475 = vector.extract_strided_slice %474 {offsets = [0, 0], sizes = [2, 128], strides = [1, 1]} : vector<2x256xf32> to vector<2x128xf32>
    %476 = arith.addf %475, %22 : vector<2x128xf32>
    %477 = math.tanh %476 : vector<2x128xf32>
    %478 = arith.mulf %477, %31 : vector<2x128xf32>
    %479 = arith.addf %478, %34 : vector<2x128xf32>
    %480 = vector.extract_strided_slice %479 {offsets = [0, 0], sizes = [2, 32], strides = [1, 1]} : vector<2x128xf32> to vector<2x32xf32>
    %481 = vector.extract_strided_slice %479 {offsets = [0, 32], sizes = [2, 32], strides = [1, 1]} : vector<2x128xf32> to vector<2x32xf32>
    %482 = vector.extract_strided_slice %479 {offsets = [0, 64], sizes = [2, 32], strides = [1, 1]} : vector<2x128xf32> to vector<2x32xf32>
    %483 = vector.extract_strided_slice %479 {offsets = [0, 96], sizes = [2, 32], strides = [1, 1]} : vector<2x128xf32> to vector<2x32xf32>
    %484 = arith.mulf %481, %456 : vector<2x32xf32>
    %485 = arith.mulf %480, %482 : vector<2x32xf32>
    %486 = arith.addf %484, %485 : vector<2x32xf32>
    %487 = math.tanh %486 : vector<2x32xf32>
    %488 = arith.mulf %483, %487 : vector<2x32xf32>
    %489 = vector.extract_strided_slice %474 {offsets = [0, 128], sizes = [2, 128], strides = [1, 1]} : vector<2x256xf32> to vector<2x128xf32>
    %490 = math.tanh %489 : vector<2x128xf32>
    %491 = arith.mulf %490, %31 : vector<2x128xf32>
    %492 = arith.addf %491, %34 : vector<2x128xf32>
    %493 = vector.extract_strided_slice %492 {offsets = [0, 0], sizes = [2, 32], strides = [1, 1]} : vector<2x128xf32> to vector<2x32xf32>
    %494 = vector.extract_strided_slice %492 {offsets = [0, 32], sizes = [2, 32], strides = [1, 1]} : vector<2x128xf32> to vector<2x32xf32>
    %495 = vector.extract_strided_slice %492 {offsets = [0, 64], sizes = [2, 32], strides = [1, 1]} : vector<2x128xf32> to vector<2x32xf32>
    %496 = vector.extract_strided_slice %492 {offsets = [0, 96], sizes = [2, 32], strides = [1, 1]} : vector<2x128xf32> to vector<2x32xf32>
    %497 = arith.mulf %494, %469 : vector<2x32xf32>
    %498 = arith.mulf %493, %495 : vector<2x32xf32>
    %499 = arith.addf %497, %498 : vector<2x32xf32>
    %500 = math.tanh %499 : vector<2x32xf32>
    %501 = arith.mulf %496, %500 : vector<2x32xf32>
    %502 = tpu.concatenate %488, %501 in 1 : vector<2x32xf32>, vector<2x32xf32> -> vector<2x64xf32>
    %cst_29 = arith.constant dense<0.000000e+00> : vector<2x256xf32>
    %503 = tpu.matmul %502, %0, %cst_29 {dimension_numbers = #tpu.dot_dimension_numbers<[1], [0], [0], [1], [0, 0, 1, 1], [], []>} : vector<2x64xf32>, vector<64x256xf32>, vector<2x256xf32> -> vector<2x256xf32>
    %504 = arith.addf %503, %3 : vector<2x256xf32>
    %505 = vector.extract_strided_slice %504 {offsets = [0, 128], sizes = [2, 128], strides = [1, 1]} : vector<2x256xf32> to vector<2x128xf32>
    %506 = math.tanh %505 : vector<2x128xf32>
    %507 = arith.mulf %506, %31 : vector<2x128xf32>
    %508 = arith.addf %507, %34 : vector<2x128xf32>
    %509 = vector.extract_strided_slice %508 {offsets = [0, 0], sizes = [2, 32], strides = [1, 1]} : vector<2x128xf32> to vector<2x32xf32>
    %510 = vector.extract_strided_slice %508 {offsets = [0, 32], sizes = [2, 32], strides = [1, 1]} : vector<2x128xf32> to vector<2x32xf32>
    %511 = vector.extract_strided_slice %508 {offsets = [0, 64], sizes = [2, 32], strides = [1, 1]} : vector<2x128xf32> to vector<2x32xf32>
    %512 = vector.extract_strided_slice %508 {offsets = [0, 96], sizes = [2, 32], strides = [1, 1]} : vector<2x128xf32> to vector<2x32xf32>
    %513 = arith.mulf %510, %499 : vector<2x32xf32>
    %514 = arith.mulf %509, %511 : vector<2x32xf32>
    %515 = arith.addf %513, %514 : vector<2x32xf32>
    %516 = math.tanh %515 : vector<2x32xf32>
    %517 = arith.mulf %512, %516 : vector<2x32xf32>
    %c0_30 = arith.constant 0 : index
    %c0_31 = arith.constant 0 : index
    %518 = vector.load %arg4[%c0_30, %c0_31] : memref<1x32xf32, #tpu.memory_space<vmem>>, vector<1x32xf32>
    %519 = vector.broadcast %518 : vector<1x32xf32> to vector<2x32xf32>
    %520 = arith.mulf %517, %519 : vector<2x32xf32>
    %cst_32 = arith.constant dense<0.000000e+00> : vector<2xf32>
    %521 = vector.multi_reduction <add>, %520, %cst_32 [1] : vector<2x32xf32> to vector<2xf32>
    %522 = vector.shape_cast %521 : vector<2xf32> to vector<2x1xf32>
    %c0_33 = arith.constant 0 : index
    %c0_34 = arith.constant 0 : index
    %523 = vector.load %arg5[%c0_33, %c0_34] : memref<1x1xf32, #tpu.memory_space<vmem>>, vector<1x1xf32>
    %524 = vector.broadcast %523 : vector<1x1xf32> to vector<2x1xf32>
    %525 = arith.addf %522, %524 : vector<2x1xf32>
    %c0_35 = arith.constant 0 : index
    %c0_36 = arith.constant 0 : index
    %526 = vector.load %arg6[%c0_35, %c0_36] : memref<2x1xf32, #tpu.memory_space<vmem>>, vector<2x1xf32>
    tpu.vector_store %arg6[%c0_35, %c0_36], %525 {strides = array<i32>} : memref<2x1xf32, #tpu.memory_space<vmem>>, vector<2x1xf32>,
    return
  }
}

</mosaic_0001>

<bundles_post_ra>
// kernel: tpu_custom_call.1
= control target key start
LH: loop header
LB: loop body
LE: loop exit
PB: predicated region body
PF: predicated region fallthrough
CT: control target
= control target key end

     0   :  { %s3221_s0 = inlined_call_operand.vmem [shape: f32[32,4], index: 0, kind: input, shape index: {}]   ;;  %s3222_s1 = inlined_call_operand.vmem [shape: f32[4,128], index: 1, kind: input, shape index: {}]   ;;  %s3223_s2 = inlined_call_operand.hbm [shape: f32[64,256], index: 2, kind: input, shape index: {}]   ;;  %s3224_s3 = inlined_call_operand.vmem [shape: f32[1,256], index: 3, kind: input, shape index: {}]   ;;  %s3225_s4 = inlined_call_operand.vmem [shape: f32[1,32], index: 4, kind: input, shape index: {}]   ;;  %s3226_s5 = inlined_call_operand.<no memory space> [shape: f32[1,1], index: 5, kind: input, shape index: {}]   ;;  %s3227_s6 = inlined_call_operand.vmem [shape: f32[2,1], index: 6, kind: output, shape index: {}]  }
   0x1   :  { %v11_v0 = vstv %s3226_s5 }
   0x2   :  { %12 = vst [vmem:[#allocation2] sm:$0x1] %v11_v0 }
   0x3   :  { %13 = vsyncpa [#allocation4], 0  ;;  %s2675_s23 = smov [#allocation3]   ;;  %s2651_s27 = scalar_lea.hbm %s3223_s2, 2048 }
   0x4   :  { %s23_s24 = sshll.u32 %s2675_s23, 4  ;;  %p2652_p0 = scmp.ne.s32.totalorder %s3223_s2, %s2651_s27  ;;  %s24_s24 = int_to_ptr.vmem [resolvable:$true] %s23_s24 }
   0x5   :  { %p2655_p1 = scmp.lt.u32.totalorder %s2651_s27, %s3223_s2 }
   0x7   :  { %p2657_p2 = pnand %p2655_p1, %p2652_p0 }
   0x9   :  { %2660 = shalt.err (!%p2657_p2)
}
   0xa   :  { %s2661_s5 = scalar_lea.vmem %s24_s24, 2048  ;;  %p2666_p4 = scmp.lt.s32.totalorder %s24_s24, %s24_s24 }
   0xb   :  { %p2662_p3 = scmp.ne.s32.totalorder %s24_s24, %s2661_s5  ;;  %p2667_p5 = scmp.lt.s32.totalorder %s2661_s5, %s2661_s5 }
   0xd   :  { %p2668_p6 = por %p2667_p5, %p2666_p4 }
   0xf   :  { %p2669_p7 = pnand %p2668_p6, %p2662_p3 }
  0x11   :  { %2672 = shalt.err (!%p2669_p7)
}
  0x12   :  { %s2676_s8 = smov 256   ;;  %s2677_s9 = smov 16  }
  0x13   :  { %29 = dma.hbm_to_vmem [thread:$0]  %s3223_s2, 2048, %s24_s24, [#allocation4], %s2676_s8, %s2676_s8, %s2677_s9  }
  0x14   :  { %2673 = dma.done.wait [#allocation4], 2048  }
  0x15   :  { %2674 = vsyncadd [#allocation4], 4294965248  ;;  %vm85_vm0 = vcmask 1043456   ;;  %vm72_vm1 = vcmask 31744   ;;  %v71_v1 = vld [vmem:[%s3222_s1] sm:$0xf]  ;;  %v57_v4 = vlaneseq }
  0x16   :  { %v67_v2 = vld [vmem:[%s3221_s0] sm:$0xff]  ;;  %v68_v3 = vld [vmem:[%s3221_s0 + $0x8] sm:$0xff]  ;;  %2251 = vmatprep.subr.msk.mxu0 %vm85_vm0, %v71_v1  ;;  %v2678_v13 = vmov 0.5   ;;  %s2680_s18 = smov 32   ;;  %v41_v28 = vld [vmem:[#allocation3 + $0x10] sm:$0xff]  ;;  %v2681_v49 = vmov 0.0  }
  0x17   :  { %2253 = vmatprep.mubr.msk.f32.mxu0 %vm72_vm1, %v67_v2  ;;  %2252 = vmatpush3.msk.msra.mxu0 %vm85_vm0, %v71_v1  ;;  %v2744_v5 = vshrl.u32 %v57_v4, 7  ;;  %v2750_v7 = vld [vmem:[%s3224_s3] sm:$0x3]  ;;  %v175_v12 = vand.u32 127, %v57_v4  ;;  %s2679_s3 = smov 64   ;;  %v40_v24 = vld [vmem:[#allocation3 + $0x8] sm:$0xff] }
  0x18   :  { %2254 = vmatmul.mubr.msk.f32.vlgmr.msra.gmra.mrb[0].mxu0 %vm72_vm1, %v68_v3  ;;  %v42_v25 = vld [vmem:[#allocation3 + $0x18] sm:$0xff]  ;;  %v39_v26 = vld [vmem:[#allocation3] sm:$0xff]  ;;  %v44_v29 = vld [vmem:[#allocation3 + $0x28] sm:$0xff]  ;;  %276 = vmatprep.mubr.f32.mxu1 %v2681_v49  ;;  %vm206_vm5 = vcmask 261120   ;;  %vm208_vm6 = vcmask 523264   ;;  %s2682_s24 = smov 96  }
  0x19   :  { %v59_v6 = vsub.s32 0, %v2744_v5  ;;  %vm176_vm2 = vcmp.ge.s32.totalorder %v175_v12, 64  ;;  %vm177_vm3 = vcmp.lt.s32.totalorder %v175_v12, 96  ;;  %v2772_v27 = vpack.c.bf16 %v42_v25, %v40_v24  ;;  %v46_v30 = vld [vmem:[#allocation3 + $0x38] sm:$0xff]  ;;  %v43_v33 = vld [vmem:[#allocation3 + $0x20] sm:$0xff]  ;;  %v45_v34 = vld [vmem:[#allocation3 + $0x30] sm:$0xff] }
  0x1a   :  { %vm178_vm4 = vmand %vm176_vm2, %vm177_vm3  ;;  %v2774_v31 = vpack.c.bf16 %v41_v28, %v39_v26  ;;  %v2776_v32 = vpack.c.bf16 %v46_v30, %v44_v29  ;;  %v48_v35 = vld [vmem:[#allocation3 + $0x48] sm:$0xff]  ;;  %v50_v36 = vld [vmem:[#allocation3 + $0x58] sm:$0xff]  ;;  %v2781_v37 = vpack.c.bf16 %v45_v34, %v43_v33  ;;  %v63_v54 = vsub.s32 1, %v2744_v5 }
  0x1b   :  { %v2753_v8 = vrot.slane %v2750_v7, %v59_v6  ;;  %v2761_v14 = vsel %vm178_vm4, 1.0, %v2678_v13  ;;  %v2763_v16 = vsel %vm178_vm4, 0.0, %v2678_v13  ;;  %2260 = vmatprep.subr.bf16.mxu1 %v2772_v27  ;;  %2276 = vmatprep.subr.bf16.mxu0 %v2772_v27  ;;  %v2785_v38 = vpack.c.bf16 %v50_v36, %v48_v35  ;;  %v47_v39 = vld [vmem:[#allocation3 + $0x40] sm:$0xff]  ;;  %v49_v40 = vld [vmem:[#allocation3 + $0x50] sm:$0xff]  ;;  %v52_v41 = vld [vmem:[#allocation3 + $0x68] sm:$0xff] }
  0x1c   :  { %2262 = vmatpush1.bf16.msra.mxu1 %v2774_v31  ;;  %2278 = vmatpush1.bf16.msra.mxu0 %v2774_v31  ;;  %v54_v42 = vld [vmem:[#allocation3 + $0x78] sm:$0xff]  ;;  %v2789_v43 = vpack.c.bf16 %v49_v40, %v47_v39  ;;  %v51_v45 = vld [vmem:[#allocation3 + $0x60] sm:$0xff]  ;;  %v53_v46 = vld [vmem:[#allocation3 + $0x70] sm:$0xff]  ;;  %v2822_v55 = vrot.slane %v2750_v7, %v63_v54  ;;  %vm2204_vm7 = vcmask 254976   ;;  %vm2216_vm8 = vcmask 1024  }
  0x1d   :  { %2264 = vmatprep.subr.bf16.mxu1 %v2776_v32  ;;  %2280 = vmatprep.subr.bf16.mxu0 %v2776_v32  ;;  %v2793_v44 = vpack.c.bf16 %v54_v42, %v52_v41  ;;  %v2798_v48 = vpack.c.bf16 %v53_v46, %v51_v45 }
  0x20   :  { %2266 = vmatpush1.bf16.msra.mxu1 %v2781_v37  ;;  %2282 = vmatpush1.bf16.msra.mxu0 %v2781_v37 }
  0x21   :  { %2268 = vmatprep.subr.bf16.mxu1 %v2785_v38  ;;  %2284 = vmatprep.subr.bf16.mxu0 %v2785_v38 }
  0x24   :  { %2270 = vmatpush1.bf16.msra.mxu1 %v2789_v43  ;;  %2286 = vmatpush1.bf16.msra.mxu0 %v2789_v43 }
  0x25   :  { %2272 = vmatprep.subr.bf16.mxu1 %v2793_v44  ;;  %2288 = vmatprep.subr.bf16.mxu0 %v2793_v44 }
  0x28   :  { %2274 = vmatpush1.bf16.msra.mxu1 %v2798_v48  ;;  %2290 = vmatpush1.bf16.msra.mxu0 %v2798_v48 }
  0x29   :  { %2292 = vmatprep.subr.bf16.mxu1 %v2772_v27  ;;  %2308 = vmatprep.subr.bf16.mxu0 %v2772_v27 }
  0xeb   :  { %v2755_v9 = vpop.f32.mrb[0].mxu0 }
  0xec   :  { %v2757_v10 = vpop.f32.mrb[1].mxu0 }
  0xed   :  { %v181_v11 = vadd.f32 %v2757_v10, %v2753_v8  ;;  %v284_v58 = vrot.slane %v2757_v10, 2  ;;  %v410_v39 = vrot.slane %v2757_v10, 4 }
  0xef   :  { %2523 = vtanh.f32 %v181_v11 }
  0xf9   :  { %v2524_v15 = vpop.eup %2523 }
  0xfa   :  { %v183_v17 = vmul.f32 %v2524_v15, %v2761_v14 }
  0xfc   :  { %v184_v18 = vadd.f32 %v183_v17, %v2763_v16 }
  0xfe   :  { %187 = vrot.lane.b32.xlu0 %v184_v18, %s2679_s3  ;;  %v185_v21 = vmul.f32 0.0, %v184_v18 }
 0x170   :  { %v188_v19 = vpop.permute.xlu0 %187 }
 0x171   :  { %v190_v20 = vmul.f32 %v188_v19, %v184_v18  ;;  %v69_v19 = vld [vmem:[%s3221_s0 + $0x10] sm:$0xff] }
 0x172   :  { %2256 = vmatprep.mubr.msk.f32.mxu0 %vm72_vm1, %v69_v19 }
 0x173   :  { %192 = vrot.lane.b32.xlu0 %v190_v20, %s2680_s18  ;;  %v70_v20 = vld [vmem:[%s3221_s0 + $0x18] sm:$0xff] }
 0x174   :  { %2257 = vmatmul.mubr.msk.f32.gmra.mrb[2].mxu0 %vm72_vm1, %v70_v20 }
 0x175   :  { %403 = vmatprep.mubr.f32.mxu0 %v2681_v49 }
 0x1e5   :  { %v193_v22 = vpop.permute.xlu0 %192 }
 0x1e6   :  { %v2769_v23 = vadd.f32 %v193_v22, %v185_v21 }
 0x1e8   :  { %2525 = vtanh.f32 %v2769_v23 }
 0x1f2   :  { %v2526_v47 = vpop.eup %2525 }
 0x1f3   :  { %198 = vrot.lane.b32.xlu1 %v2526_v47, %s2679_s3 }
 0x247   :  { %v2849_v28 = vpop.f32.mrb[2].mxu0 }
 0x248   :  { %v2851_v29 = vpop.f32.mrb[3].mxu0 }
 0x265   :  { %v199_v50 = vpop.permute.xlu1 %198 }
 0x266   :  { %v201_v51 = vmul.f32 %v199_v50, %v184_v18 }
 0x268   :  { %203 = vrot.lane.b32.xlu1 %v201_v51, %s2680_s18 }
 0x2da   :  { %v204_v52 = vpop.permute.xlu1 %203 }
 0x2db   :  { %v207_v53 = vsel %vm206_vm5, %v204_v52, 0.0 }
 0x2dc   :  { %2228 = vmatmul.mubr.msk.f32.vlgmr.msra.gmra.mrb[0].mxu1 %vm208_vm6, %v207_v53 }
 0x2dd   :  { %2294 = vmatpush1.bf16.msra.mxu1 %v2774_v31  ;;  %529 = vmatprep.mubr.f32.mxu1 %v2681_v49 }
 0x2de   :  { %2296 = vmatprep.subr.bf16.mxu1 %v2776_v32 }
 0x2e1   :  { %2298 = vmatpush1.bf16.msra.mxu1 %v2781_v37 }
 0x2e2   :  { %2300 = vmatprep.subr.bf16.mxu1 %v2785_v38 }
 0x2e5   :  { %2302 = vmatpush1.bf16.msra.mxu1 %v2789_v43 }
 0x2e6   :  { %2304 = vmatprep.subr.bf16.mxu1 %v2793_v44 }
 0x2e9   :  { %2306 = vmatpush1.bf16.msra.mxu1 %v2798_v48 }
 0x2ea   :  { %2324 = vmatprep.subr.bf16.mxu1 %v2772_v27 }
 0x3af   :  { %v278_v56 = vpop.f32.mrb[0].mxu1 }
 0x3b0   :  { %v279_v57 = vadd.f32 %v278_v56, %v2753_v8  ;;  %v280_v59 = vpop.f32.mrb[1].mxu1 }
 0x3b1   :  { %v281_v60 = vadd.f32 %v280_v59, %v2822_v55 }
 0x3b2   :  { %v286_v61 = vadd.f32 %v284_v58, %v279_v57 }
 0x3b3   :  { %2527 = vtanh.f32 %v281_v60 }
 0x3b4   :  { %2529 = vtanh.f32 %v286_v61 }
 0x3bd   :  { %v2528_v62 = vpop.eup %2527 }
 0x3be   :  { %v2530_v63 = vpop.eup %2529  ;;  %v308_v0 = vmul.f32 %v2528_v62, %v2761_v14 }
 0x3bf   :  { %v288_v1 = vmul.f32 %v2530_v63, %v2761_v14 }
 0x3c0   :  { %v309_v2 = vadd.f32 %v308_v0, %v2763_v16 }
 0x3c1   :  { %v289_v3 = vadd.f32 %v288_v1, %v2763_v16 }
 0x3c2   :  { %312 = vrot.lane.b32.xlu1 %v309_v2, %s2679_s3  ;;  %v310_v11 = vmul.f32 0.0, %v309_v2 }
 0x3c3   :  { %292 = vrot.lane.b32.xlu0 %v289_v3, %s2679_s3  ;;  %v290_v13 = vmul.f32 %v289_v3, %v2769_v23 }
 0x434   :  { %v313_v4 = vpop.permute.xlu1 %312 }
 0x435   :  { %v315_v5 = vmul.f32 %v313_v4, %v309_v2  ;;  %v293_v6 = vpop.permute.xlu0 %292 }
 0x436   :  { %v295_v7 = vmul.f32 %v293_v6, %v289_v3 }
 0x437   :  { %317 = vrot.lane.b32.xlu1 %v315_v5, %s2680_s18 }
 0x438   :  { %297 = vrot.lane.b32.xlu0 %v295_v7, %s2680_s18 }
 0x4a9   :  { %v318_v12 = vpop.permute.xlu1 %317 }
 0x4aa   :  { %v320_v15 = vadd.f32 %v318_v12, %v310_v11  ;;  %v298_v17 = vpop.permute.xlu0 %297 }
 0x4ab   :  { %v300_v18 = vadd.f32 %v298_v17, %v290_v13 }
 0x4ac   :  { %2531 = vtanh.f32 %v320_v15 }
 0x4ad   :  { %2533 = vtanh.f32 %v300_v18 }
 0x4b6   :  { %v2532_v21 = vpop.eup %2531 }
 0x4b7   :  { %v2534_v22 = vpop.eup %2533  ;;  %323 = vrot.lane.b32.xlu1 %v2532_v21, %s2679_s3 }
 0x4b8   :  { %303 = vrot.lane.b32.xlu0 %v2534_v22, %s2679_s3 }
 0x529   :  { %v324_v23 = vpop.permute.xlu1 %323 }
 0x52a   :  { %v326_v24 = vmul.f32 %v324_v23, %v309_v2  ;;  %v304_v25 = vpop.permute.xlu0 %303 }
 0x52b   :  { %v306_v26 = vmul.f32 %v304_v25, %v289_v3 }
 0x52c   :  { %332 = vrot.lane.b32.xlu1 %v326_v24, %s2679_s3 }
 0x52d   :  { %328 = vrot.lane.b32.xlu0 %v306_v26, %s2680_s18 }
 0x59e   :  { %v333_v30 = vpop.permute.xlu1 %332 }
 0x59f   :  { %v329_v33 = vpop.permute.xlu0 %328 }
 0x5a0   :  { %v335_v34 = vsel %vm206_vm5, %v329_v33, %v333_v30 }
 0x5a1   :  { %2229 = vmatmul.mubr.msk.f32.vlgmr.msra.gmra.mrb[4].mxu0 %vm208_vm6, %v335_v34 }
 0x5a2   :  { %2310 = vmatpush1.bf16.msra.mxu0 %v2774_v31  ;;  %655 = vmatprep.mubr.f32.mxu0 %v2681_v49 }
 0x5a3   :  { %2312 = vmatprep.subr.bf16.mxu0 %v2776_v32 }
 0x5a6   :  { %2314 = vmatpush1.bf16.msra.mxu0 %v2781_v37 }
 0x5a7   :  { %2316 = vmatprep.subr.bf16.mxu0 %v2785_v38 }
 0x5aa   :  { %2318 = vmatpush1.bf16.msra.mxu0 %v2789_v43 }
 0x5ab   :  { %2320 = vmatprep.subr.bf16.mxu0 %v2793_v44 }
 0x5ae   :  { %2322 = vmatpush1.bf16.msra.mxu0 %v2798_v48 }
 0x5af   :  { %2340 = vmatprep.subr.bf16.mxu0 %v2772_v27 }
 0x674   :  { %v405_v35 = vpop.f32.mrb[4].mxu0 }
 0x675   :  { %v406_v36 = vadd.f32 %v405_v35, %v2753_v8  ;;  %v407_v40 = vpop.f32.mrb[5].mxu0 }
 0x676   :  { %v408_v41 = vadd.f32 %v407_v40, %v2822_v55 }
 0x677   :  { %v412_v42 = vadd.f32 %v410_v39, %v406_v36 }
 0x678   :  { %2535 = vtanh.f32 %v408_v41 }
 0x679   :  { %2537 = vtanh.f32 %v412_v42 }
 0x682   :  { %v2536_v45 = vpop.eup %2535 }
 0x683   :  { %v2538_v46 = vpop.eup %2537  ;;  %v434_v47 = vmul.f32 %v2536_v45, %v2761_v14 }
 0x684   :  { %v414_v50 = vmul.f32 %v2538_v46, %v2761_v14 }
 0x685   :  { %v435_v51 = vadd.f32 %v434_v47, %v2763_v16 }
 0x686   :  { %v415_v52 = vadd.f32 %v414_v50, %v2763_v16 }
 0x687   :  { %438 = vrot.lane.b32.xlu1 %v435_v51, %s2679_s3  ;;  %v436_v58 = vmul.f32 %v435_v51, %v320_v15  ;;  %v536_v15 = vrot.slane %v2757_v10, 6 }
 0x688   :  { %418 = vrot.lane.b32.xlu0 %v415_v52, %s2679_s3  ;;  %v416_v60 = vmul.f32 %v415_v52, %v300_v18 }
 0x6f9   :  { %v439_v53 = vpop.permute.xlu1 %438 }
 0x6fa   :  { %v441_v54 = vmul.f32 %v439_v53, %v435_v51  ;;  %v419_v56 = vpop.permute.xlu0 %418 }
 0x6fb   :  { %v421_v57 = vmul.f32 %v419_v56, %v415_v52 }
 0x6fc   :  { %443 = vrot.lane.b32.xlu1 %v441_v54, %s2680_s18 }
 0x6fd   :  { %423 = vrot.lane.b32.xlu0 %v421_v57, %s2680_s18 }
 0x76e   :  { %v444_v59 = vpop.permute.xlu1 %443 }
 0x76f   :  { %v446_v61 = vadd.f32 %v444_v59, %v436_v58  ;;  %v424_v62 = vpop.permute.xlu0 %423 }
 0x770   :  { %v426_v63 = vadd.f32 %v424_v62, %v416_v60 }
 0x771   :  { %2539 = vtanh.f32 %v446_v61 }
 0x772   :  { %2541 = vtanh.f32 %v426_v63 }
 0x77b   :  { %v2540_v0 = vpop.eup %2539 }
 0x77c   :  { %v2542_v1 = vpop.eup %2541  ;;  %449 = vrot.lane.b32.xlu1 %v2540_v0, %s2679_s3 }
 0x77d   :  { %429 = vrot.lane.b32.xlu0 %v2542_v1, %s2679_s3 }
 0x7ee   :  { %v450_v2 = vpop.permute.xlu1 %449 }
 0x7ef   :  { %v452_v3 = vmul.f32 %v450_v2, %v435_v51  ;;  %v430_v4 = vpop.permute.xlu0 %429 }
 0x7f0   :  { %v432_v5 = vmul.f32 %v430_v4, %v415_v52 }
 0x7f1   :  { %458 = vrot.lane.b32.xlu1 %v452_v3, %s2679_s3 }
 0x7f2   :  { %454 = vrot.lane.b32.xlu0 %v432_v5, %s2680_s18 }
 0x863   :  { %v459_v6 = vpop.permute.xlu1 %458 }
 0x864   :  { %v455_v7 = vpop.permute.xlu0 %454 }
 0x865   :  { %v461_v11 = vsel %vm206_vm5, %v455_v7, %v459_v6 }
 0x866   :  { %2230 = vmatmul.mubr.msk.f32.vlgmr.msra.gmra.mrb[2].mxu1 %vm208_vm6, %v461_v11 }
 0x867   :  { %2326 = vmatpush1.bf16.msra.mxu1 %v2774_v31  ;;  %779 = vmatprep.mubr.f32.mxu1 %v2681_v49 }
 0x868   :  { %2328 = vmatprep.subr.bf16.mxu1 %v2776_v32 }
 0x86b   :  { %2330 = vmatpush1.bf16.msra.mxu1 %v2781_v37 }
 0x86c   :  { %2332 = vmatprep.subr.bf16.mxu1 %v2785_v38 }
 0x86f   :  { %2334 = vmatpush1.bf16.msra.mxu1 %v2789_v43 }
 0x870   :  { %2336 = vmatprep.subr.bf16.mxu1 %v2793_v44 }
 0x873   :  { %2338 = vmatpush1.bf16.msra.mxu1 %v2798_v48 }
 0x874   :  { %2356 = vmatprep.subr.bf16.mxu1 %v2772_v27 }
 0x939   :  { %v531_v12 = vpop.f32.mrb[2].mxu1 }
 0x93a   :  { %v532_v13 = vadd.f32 %v531_v12, %v2753_v8  ;;  %v533_v17 = vpop.f32.mrb[3].mxu1 }
 0x93b   :  { %v534_v18 = vadd.f32 %v533_v17, %v2822_v55 }
 0x93c   :  { %v538_v19 = vadd.f32 %v536_v15, %v532_v13 }
 0x93d   :  { %2543 = vtanh.f32 %v534_v18 }
 0x93e   :  { %2545 = vtanh.f32 %v538_v19 }
 0x947   :  { %v2544_v20 = vpop.eup %2543 }
 0x948   :  { %v2546_v21 = vpop.eup %2545  ;;  %v560_v22 = vmul.f32 %v2544_v20, %v2761_v14 }
 0x949   :  { %v540_v23 = vmul.f32 %v2546_v21, %v2761_v14 }
 0x94a   :  { %v561_v24 = vadd.f32 %v560_v22, %v2763_v16 }
 0x94b   :  { %v541_v25 = vadd.f32 %v540_v23, %v2763_v16 }
 0x94c   :  { %564 = vrot.lane.b32.xlu1 %v561_v24, %s2679_s3  ;;  %v562_v34 = vmul.f32 %v561_v24, %v446_v61 }
 0x94d   :  { %544 = vrot.lane.b32.xlu0 %v541_v25, %s2679_s3  ;;  %v542_v36 = vmul.f32 %v541_v25, %v426_v63 }
 0x9be   :  { %v565_v10 = vpop.permute.xlu1 %564 }
 0x9bf   :  { %v567_v26 = vmul.f32 %v565_v10, %v561_v24  ;;  %v545_v30 = vpop.permute.xlu0 %544 }
 0x9c0   :  { %v547_v33 = vmul.f32 %v545_v30, %v541_v25 }
 0x9c1   :  { %569 = vrot.lane.b32.xlu1 %v567_v26, %s2680_s18 }
 0x9c2   :  { %549 = vrot.lane.b32.xlu0 %v547_v33, %s2680_s18  ;;  %v787_v33 = vrot.slane %v2755_v9, 2 }
 0xa33   :  { %v570_v35 = vpop.permute.xlu1 %569 }
 0xa34   :  { %v572_v39 = vadd.f32 %v570_v35, %v562_v34  ;;  %v550_v40 = vpop.permute.xlu0 %549 }
 0xa35   :  { %v552_v41 = vadd.f32 %v550_v40, %v542_v36 }
 0xa36   :  { %2547 = vtanh.f32 %v572_v39 }
 0xa37   :  { %2549 = vtanh.f32 %v552_v41 }
 0xa40   :  { %v2548_v42 = vpop.eup %2547 }
 0xa41   :  { %v2550_v45 = vpop.eup %2549  ;;  %575 = vrot.lane.b32.xlu1 %v2548_v42, %s2679_s3 }
 0xa42   :  { %555 = vrot.lane.b32.xlu0 %v2550_v45, %s2679_s3 }
 0xab3   :  { %v576_v46 = vpop.permute.xlu1 %575 }
 0xab4   :  { %v578_v47 = vmul.f32 %v576_v46, %v561_v24  ;;  %v556_v50 = vpop.permute.xlu0 %555 }
 0xab5   :  { %v558_v51 = vmul.f32 %v556_v50, %v541_v25 }
 0xab6   :  { %584 = vrot.lane.b32.xlu1 %v578_v47, %s2679_s3 }
 0xab7   :  { %580 = vrot.lane.b32.xlu0 %v558_v51, %s2680_s18 }
 0xb28   :  { %v585_v52 = vpop.permute.xlu1 %584 }
 0xb29   :  { %v581_v53 = vpop.permute.xlu0 %580 }
 0xb2a   :  { %v587_v54 = vsel %vm206_vm5, %v581_v53, %v585_v52 }
 0xb2b   :  { %2231 = vmatmul.mubr.msk.f32.vlgmr.msra.gmra.mrb[6].mxu0 %vm208_vm6, %v587_v54 }
 0xb2c   :  { %2342 = vmatpush1.bf16.msra.mxu0 %v2774_v31  ;;  %906 = vmatprep.mubr.f32.mxu0 %v2681_v49 }
 0xb2d   :  { %2344 = vmatprep.subr.bf16.mxu0 %v2776_v32 }
 0xb30   :  { %2346 = vmatpush1.bf16.msra.mxu0 %v2781_v37 }
 0xb31   :  { %2348 = vmatprep.subr.bf16.mxu0 %v2785_v38 }
 0xb34   :  { %2350 = vmatpush1.bf16.msra.mxu0 %v2789_v43 }
 0xb35   :  { %2352 = vmatprep.subr.bf16.mxu0 %v2793_v44 }
 0xb38   :  { %2354 = vmatpush1.bf16.msra.mxu0 %v2798_v48 }
 0xb39   :  { %2372 = vmatprep.subr.bf16.mxu0 %v2772_v27 }
 0xbfe   :  { %v657_v56 = vpop.f32.mrb[6].mxu0 }
 0xbff   :  { %v658_v57 = vadd.f32 %v657_v56, %v2753_v8  ;;  %v659_v58 = vpop.f32.mrb[7].mxu0 }
 0xc00   :  { %v660_v59 = vadd.f32 %v659_v58, %v2822_v55 }
 0xc01   :  { %v662_v60 = vadd.f32 %v2755_v9, %v658_v57 }
 0xc02   :  { %2551 = vtanh.f32 %v660_v59 }
 0xc03   :  { %2553 = vtanh.f32 %v662_v60 }
 0xc0c   :  { %v2552_v61 = vpop.eup %2551 }
 0xc0d   :  { %v2554_v62 = vpop.eup %2553  ;;  %v684_v63 = vmul.f32 %v2552_v61, %v2761_v14 }
 0xc0e   :  { %v664_v0 = vmul.f32 %v2554_v62, %v2761_v14 }
 0xc0f   :  { %v685_v1 = vadd.f32 %v684_v63, %v2763_v16 }
 0xc10   :  { %v665_v2 = vadd.f32 %v664_v0, %v2763_v16 }
 0xc11   :  { %688 = vrot.lane.b32.xlu1 %v685_v1, %s2679_s3  ;;  %v686_v7 = vmul.f32 %v685_v1, %v572_v39 }
 0xc12   :  { %668 = vrot.lane.b32.xlu0 %v665_v2, %s2679_s3  ;;  %v666_v12 = vmul.f32 %v665_v2, %v552_v41 }
 0xc83   :  { %v689_v3 = vpop.permute.xlu1 %688 }
 0xc84   :  { %v691_v4 = vmul.f32 %v689_v3, %v685_v1  ;;  %v669_v5 = vpop.permute.xlu0 %668 }
 0xc85   :  { %v671_v6 = vmul.f32 %v669_v5, %v665_v2 }
 0xc86   :  { %693 = vrot.lane.b32.xlu1 %v691_v4, %s2680_s18 }
 0xc87   :  { %673 = vrot.lane.b32.xlu0 %v671_v6, %s2680_s18 }
 0xcf8   :  { %v694_v11 = vpop.permute.xlu1 %693 }
 0xcf9   :  { %v696_v13 = vadd.f32 %v694_v11, %v686_v7  ;;  %v674_v15 = vpop.permute.xlu0 %673  ;;  %v913_v7 = vrot.slane %v2755_v9, 4 }
 0xcfa   :  { %v676_v17 = vadd.f32 %v674_v15, %v666_v12 }
 0xcfb   :  { %2555 = vtanh.f32 %v696_v13 }
 0xcfc   :  { %2557 = vtanh.f32 %v676_v17 }
 0xd05   :  { %v2556_v18 = vpop.eup %2555 }
 0xd06   :  { %v2558_v19 = vpop.eup %2557  ;;  %699 = vrot.lane.b32.xlu1 %v2556_v18, %s2679_s3 }
 0xd07   :  { %679 = vrot.lane.b32.xlu0 %v2558_v19, %s2679_s3 }
 0xd78   :  { %v700_v20 = vpop.permute.xlu1 %699 }
 0xd79   :  { %v702_v21 = vmul.f32 %v700_v20, %v685_v1  ;;  %v680_v22 = vpop.permute.xlu0 %679 }
 0xd7a   :  { %v682_v23 = vmul.f32 %v680_v22, %v665_v2 }
 0xd7b   :  { %708 = vrot.lane.b32.xlu1 %v702_v21, %s2679_s3 }
 0xd7c   :  { %704 = vrot.lane.b32.xlu0 %v682_v23, %s2680_s18 }
 0xded   :  { %v709_v24 = vpop.permute.xlu1 %708 }
 0xdee   :  { %v705_v25 = vpop.permute.xlu0 %704 }
 0xdef   :  { %v711_v10 = vsel %vm206_vm5, %v705_v25, %v709_v24 }
 0xdf0   :  { %2232 = vmatmul.mubr.msk.f32.vlgmr.msra.gmra.mrb[4].mxu1 %vm208_vm6, %v711_v10 }
 0xdf1   :  { %2358 = vmatpush1.bf16.msra.mxu1 %v2774_v31  ;;  %1032 = vmatprep.mubr.f32.mxu1 %v2681_v49 }
 0xdf2   :  { %2360 = vmatprep.subr.bf16.mxu1 %v2776_v32 }
 0xdf5   :  { %2362 = vmatpush1.bf16.msra.mxu1 %v2781_v37 }
 0xdf6   :  { %2364 = vmatprep.subr.bf16.mxu1 %v2785_v38 }
 0xdf9   :  { %2366 = vmatpush1.bf16.msra.mxu1 %v2789_v43 }
 0xdfa   :  { %2368 = vmatprep.subr.bf16.mxu1 %v2793_v44 }
 0xdfd   :  { %2370 = vmatpush1.bf16.msra.mxu1 %v2798_v48 }
 0xdfe   :  { %2388 = vmatprep.subr.bf16.mxu1 %v2772_v27 }
 0xec3   :  { %v781_v26 = vpop.f32.mrb[4].mxu1 }
 0xec4   :  { %v782_v30 = vadd.f32 %v781_v26, %v2753_v8  ;;  %v783_v34 = vpop.f32.mrb[5].mxu1 }
 0xec5   :  { %v784_v35 = vadd.f32 %v783_v34, %v2822_v55 }
 0xec6   :  { %v789_v36 = vadd.f32 %v787_v33, %v782_v30 }
 0xec7   :  { %2559 = vtanh.f32 %v784_v35 }
 0xec8   :  { %2561 = vtanh.f32 %v789_v36 }
 0xed1   :  { %v2560_v39 = vpop.eup %2559 }
 0xed2   :  { %v2562_v40 = vpop.eup %2561  ;;  %v811_v41 = vmul.f32 %v2560_v39, %v2761_v14 }
 0xed3   :  { %v791_v42 = vmul.f32 %v2562_v40, %v2761_v14 }
 0xed4   :  { %v812_v45 = vadd.f32 %v811_v41, %v2763_v16 }
 0xed5   :  { %v792_v46 = vadd.f32 %v791_v42, %v2763_v16 }
 0xed6   :  { %815 = vrot.lane.b32.xlu1 %v812_v45, %s2679_s3  ;;  %v813_v53 = vmul.f32 %v812_v45, %v696_v13 }
 0xed7   :  { %795 = vrot.lane.b32.xlu0 %v792_v46, %s2679_s3  ;;  %v793_v56 = vmul.f32 %v792_v46, %v676_v17 }
 0xf48   :  { %v816_v47 = vpop.permute.xlu1 %815 }
 0xf49   :  { %v818_v50 = vmul.f32 %v816_v47, %v812_v45  ;;  %v796_v51 = vpop.permute.xlu0 %795 }
 0xf4a   :  { %v798_v52 = vmul.f32 %v796_v51, %v792_v46 }
 0xf4b   :  { %820 = vrot.lane.b32.xlu1 %v818_v50, %s2680_s18 }
 0xf4c   :  { %800 = vrot.lane.b32.xlu0 %v798_v52, %s2680_s18 }
 0xfbd   :  { %v821_v54 = vpop.permute.xlu1 %820 }
 0xfbe   :  { %v823_v57 = vadd.f32 %v821_v54, %v813_v53  ;;  %v801_v58 = vpop.permute.xlu0 %800  ;;  %v1039_v53 = vrot.slane %v2755_v9, 6 }
 0xfbf   :  { %v803_v59 = vadd.f32 %v801_v58, %v793_v56 }
 0xfc0   :  { %2563 = vtanh.f32 %v823_v57 }
 0xfc1   :  { %2565 = vtanh.f32 %v803_v59 }
 0xfca   :  { %v2564_v60 = vpop.eup %2563 }
 0xfcb   :  { %v2566_v61 = vpop.eup %2565  ;;  %826 = vrot.lane.b32.xlu1 %v2564_v60, %s2679_s3 }
 0xfcc   :  { %806 = vrot.lane.b32.xlu0 %v2566_v61, %s2679_s3 }
0x103d   :  { %v827_v62 = vpop.permute.xlu1 %826 }
0x103e   :  { %v829_v63 = vmul.f32 %v827_v62, %v812_v45  ;;  %v807_v0 = vpop.permute.xlu0 %806 }
0x103f   :  { %v809_v1 = vmul.f32 %v807_v0, %v792_v46 }
0x1040   :  { %835 = vrot.lane.b32.xlu1 %v829_v63, %s2679_s3 }
0x1041   :  { %831 = vrot.lane.b32.xlu0 %v809_v1, %s2680_s18 }
0x10b2   :  { %v836_v2 = vpop.permute.xlu1 %835 }
0x10b3   :  { %v832_v3 = vpop.permute.xlu0 %831 }
0x10b4   :  { %v838_v4 = vsel %vm206_vm5, %v832_v3, %v836_v2 }
0x10b5   :  { %2233 = vmatmul.mubr.msk.f32.vlgmr.msra.gmra.mrb[8].mxu0 %vm208_vm6, %v838_v4 }
0x10b6   :  { %2374 = vmatpush1.bf16.msra.mxu0 %v2774_v31  ;;  %1158 = vmatprep.mubr.f32.mxu0 %v2681_v49 }
0x10b7   :  { %2376 = vmatprep.subr.bf16.mxu0 %v2776_v32 }
0x10ba   :  { %2378 = vmatpush1.bf16.msra.mxu0 %v2781_v37 }
0x10bb   :  { %2380 = vmatprep.subr.bf16.mxu0 %v2785_v38 }
0x10be   :  { %2382 = vmatpush1.bf16.msra.mxu0 %v2789_v43 }
0x10bf   :  { %2384 = vmatprep.subr.bf16.mxu0 %v2793_v44 }
0x10c2   :  { %2386 = vmatpush1.bf16.msra.mxu0 %v2798_v48 }
0x10c3   :  { %2404 = vmatprep.subr.bf16.mxu0 %v2772_v27 }
0x1188   :  { %v908_v5 = vpop.f32.mrb[8].mxu0 }
0x1189   :  { %v909_v6 = vadd.f32 %v908_v5, %v2753_v8  ;;  %v910_v11 = vpop.f32.mrb[9].mxu0 }
0x118a   :  { %v911_v12 = vadd.f32 %v910_v11, %v2822_v55 }
0x118b   :  { %v915_v13 = vadd.f32 %v913_v7, %v909_v6 }
0x118c   :  { %2567 = vtanh.f32 %v911_v12 }
0x118d   :  { %2569 = vtanh.f32 %v915_v13 }
0x1196   :  { %v2568_v15 = vpop.eup %2567 }
0x1197   :  { %v2570_v17 = vpop.eup %2569  ;;  %v937_v18 = vmul.f32 %v2568_v15, %v2761_v14 }
0x1198   :  { %v917_v19 = vmul.f32 %v2570_v17, %v2761_v14 }
0x1199   :  { %v938_v20 = vadd.f32 %v937_v18, %v2763_v16 }
0x119a   :  { %v918_v21 = vadd.f32 %v917_v19, %v2763_v16 }
0x119b   :  { %941 = vrot.lane.b32.xlu1 %v938_v20, %s2679_s3  ;;  %v939_v10 = vmul.f32 %v938_v20, %v823_v57 }
0x119c   :  { %921 = vrot.lane.b32.xlu0 %v918_v21, %s2679_s3  ;;  %v919_v30 = vmul.f32 %v918_v21, %v803_v59 }
0x120d   :  { %v942_v22 = vpop.permute.xlu1 %941 }
0x120e   :  { %v944_v23 = vmul.f32 %v942_v22, %v938_v20  ;;  %v922_v24 = vpop.permute.xlu0 %921 }
0x120f   :  { %v924_v25 = vmul.f32 %v922_v24, %v918_v21 }
0x1210   :  { %946 = vrot.lane.b32.xlu1 %v944_v23, %s2680_s18 }
0x1211   :  { %926 = vrot.lane.b32.xlu0 %v924_v25, %s2680_s18 }
0x1282   :  { %v947_v26 = vpop.permute.xlu1 %946 }
0x1283   :  { %v949_v33 = vadd.f32 %v947_v26, %v939_v10  ;;  %v927_v34 = vpop.permute.xlu0 %926 }
0x1284   :  { %v929_v35 = vadd.f32 %v927_v34, %v919_v30 }
0x1285   :  { %2571 = vtanh.f32 %v949_v33 }
0x1286   :  { %2573 = vtanh.f32 %v929_v35 }
0x128f   :  { %v2572_v36 = vpop.eup %2571 }
0x1290   :  { %v2574_v39 = vpop.eup %2573  ;;  %952 = vrot.lane.b32.xlu1 %v2572_v36, %s2679_s3 }
0x1291   :  { %932 = vrot.lane.b32.xlu0 %v2574_v39, %s2679_s3 }
0x1302   :  { %v953_v40 = vpop.permute.xlu1 %952 }
0x1303   :  { %v955_v41 = vmul.f32 %v953_v40, %v938_v20  ;;  %v933_v42 = vpop.permute.xlu0 %932 }
0x1304   :  { %v935_v45 = vmul.f32 %v933_v42, %v918_v21 }
0x1305   :  { %961 = vrot.lane.b32.xlu1 %v955_v41, %s2679_s3 }
0x1306   :  { %957 = vrot.lane.b32.xlu0 %v935_v45, %s2680_s18 }
0x1377   :  { %v962_v46 = vpop.permute.xlu1 %961 }
0x1378   :  { %v958_v47 = vpop.permute.xlu0 %957 }
0x1379   :  { %v964_v50 = vsel %vm206_vm5, %v958_v47, %v962_v46 }
0x137a   :  { %2234 = vmatmul.mubr.msk.f32.vlgmr.msra.gmra.mrb[6].mxu1 %vm208_vm6, %v964_v50 }
0x137b   :  { %2390 = vmatpush1.bf16.msra.mxu1 %v2774_v31  ;;  %1282 = vmatprep.mubr.f32.mxu1 %v2681_v49 }
0x137c   :  { %2392 = vmatprep.subr.bf16.mxu1 %v2776_v32 }
0x137f   :  { %2394 = vmatpush1.bf16.msra.mxu1 %v2781_v37 }
0x1380   :  { %2396 = vmatprep.subr.bf16.mxu1 %v2785_v38 }
0x1383   :  { %2398 = vmatpush1.bf16.msra.mxu1 %v2789_v43 }
0x1384   :  { %2400 = vmatprep.subr.bf16.mxu1 %v2793_v44 }
0x1387   :  { %2402 = vmatpush1.bf16.msra.mxu1 %v2798_v48 }
0x1388   :  { %2420 = vmatprep.subr.bf16.mxu1 %v2772_v27 }
0x144d   :  { %v1034_v51 = vpop.f32.mrb[6].mxu1 }
0x144e   :  { %v1035_v52 = vadd.f32 %v1034_v51, %v2753_v8  ;;  %v1036_v54 = vpop.f32.mrb[7].mxu1 }
0x144f   :  { %v1037_v56 = vadd.f32 %v1036_v54, %v2822_v55 }
0x1450   :  { %v1041_v57 = vadd.f32 %v1039_v53, %v1035_v52 }
0x1451   :  { %2575 = vtanh.f32 %v1037_v56 }
0x1452   :  { %2577 = vtanh.f32 %v1041_v57 }
0x145b   :  { %v2576_v58 = vpop.eup %2575 }
0x145c   :  { %v2578_v59 = vpop.eup %2577  ;;  %v1063_v60 = vmul.f32 %v2576_v58, %v2761_v14 }
0x145d   :  { %v1043_v61 = vmul.f32 %v2578_v59, %v2761_v14 }
0x145e   :  { %v1064_v62 = vadd.f32 %v1063_v60, %v2763_v16 }
0x145f   :  { %v1044_v63 = vadd.f32 %v1043_v61, %v2763_v16 }
0x1460   :  { %1067 = vrot.lane.b32.xlu1 %v1064_v62, %s2679_s3  ;;  %v1065_v3 = vmul.f32 %v1064_v62, %v949_v33 }
0x1461   :  { %1047 = vrot.lane.b32.xlu0 %v1044_v63, %s2679_s3  ;;  %v1045_v5 = vmul.f32 %v1044_v63, %v929_v35 }
0x14d2   :  { %v1068_v9 = vpop.permute.xlu1 %1067 }
0x14d3   :  { %v1070_v0 = vmul.f32 %v1068_v9, %v1064_v62  ;;  %v1048_v1 = vpop.permute.xlu0 %1047 }
0x14d4   :  { %v1050_v2 = vmul.f32 %v1048_v1, %v1044_v63  ;;  %v1290_v1 = vrot.slane %v2851_v29, 2 }
0x14d5   :  { %1072 = vrot.lane.b32.xlu1 %v1070_v0, %s2680_s18 }
0x14d6   :  { %1052 = vrot.lane.b32.xlu0 %v1050_v2, %s2680_s18 }
0x1547   :  { %v1073_v4 = vpop.permute.xlu1 %1072 }
0x1548   :  { %v1075_v6 = vadd.f32 %v1073_v4, %v1065_v3  ;;  %v1053_v7 = vpop.permute.xlu0 %1052 }
0x1549   :  { %v1055_v11 = vadd.f32 %v1053_v7, %v1045_v5 }
0x154a   :  { %2579 = vtanh.f32 %v1075_v6 }
0x154b   :  { %2581 = vtanh.f32 %v1055_v11 }
0x1554   :  { %v2580_v12 = vpop.eup %2579 }
0x1555   :  { %v2582_v13 = vpop.eup %2581  ;;  %1078 = vrot.lane.b32.xlu1 %v2580_v12, %s2679_s3 }
0x1556   :  { %1058 = vrot.lane.b32.xlu0 %v2582_v13, %s2679_s3 }
0x15c7   :  { %v1079_v15 = vpop.permute.xlu1 %1078 }
0x15c8   :  { %v1081_v17 = vmul.f32 %v1079_v15, %v1064_v62  ;;  %v1059_v18 = vpop.permute.xlu0 %1058 }
0x15c9   :  { %v1061_v19 = vmul.f32 %v1059_v18, %v1044_v63 }
0x15ca   :  { %1087 = vrot.lane.b32.xlu1 %v1081_v17, %s2679_s3 }
0x15cb   :  { %1083 = vrot.lane.b32.xlu0 %v1061_v19, %s2680_s18 }
0x163c   :  { %v1088_v20 = vpop.permute.xlu1 %1087 }
0x163d   :  { %v1084_v21 = vpop.permute.xlu0 %1083 }
0x163e   :  { %v1090_v22 = vsel %vm206_vm5, %v1084_v21, %v1088_v20 }
0x163f   :  { %2235 = vmatmul.mubr.msk.f32.vlgmr.msra.gmra.mrb[10].mxu0 %vm208_vm6, %v1090_v22 }
0x1640   :  { %2406 = vmatpush1.bf16.msra.mxu0 %v2774_v31  ;;  %1409 = vmatprep.mubr.f32.mxu0 %v2681_v49 }
0x1641   :  { %2408 = vmatprep.subr.bf16.mxu0 %v2776_v32 }
0x1644   :  { %2410 = vmatpush1.bf16.msra.mxu0 %v2781_v37 }
0x1645   :  { %2412 = vmatprep.subr.bf16.mxu0 %v2785_v38 }
0x1648   :  { %2414 = vmatpush1.bf16.msra.mxu0 %v2789_v43 }
0x1649   :  { %2416 = vmatprep.subr.bf16.mxu0 %v2793_v44 }
0x164c   :  { %2418 = vmatpush1.bf16.msra.mxu0 %v2798_v48 }
0x164d   :  { %2436 = vmatprep.subr.bf16.mxu0 %v2772_v27 }
0x1712   :  { %v1160_v23 = vpop.f32.mrb[10].mxu0 }
0x1713   :  { %v1161_v24 = vadd.f32 %v1160_v23, %v2753_v8  ;;  %v1162_v25 = vpop.f32.mrb[11].mxu0 }
0x1714   :  { %v1163_v10 = vadd.f32 %v1162_v25, %v2822_v55 }
0x1715   :  { %v1165_v26 = vadd.f32 %v1161_v24, %v2851_v29 }
0x1716   :  { %2583 = vtanh.f32 %v1163_v10 }
0x1717   :  { %2585 = vtanh.f32 %v1165_v26 }
0x1720   :  { %v2584_v30 = vpop.eup %2583 }
0x1721   :  { %v2586_v33 = vpop.eup %2585  ;;  %v1187_v34 = vmul.f32 %v2584_v30, %v2761_v14 }
0x1722   :  { %v1167_v35 = vmul.f32 %v2586_v33, %v2761_v14 }
0x1723   :  { %v1188_v36 = vadd.f32 %v1187_v34, %v2763_v16 }
0x1724   :  { %v1168_v39 = vadd.f32 %v1167_v35, %v2763_v16 }
0x1725   :  { %1191 = vrot.lane.b32.xlu1 %v1188_v36, %s2679_s3  ;;  %v1189_v46 = vmul.f32 %v1188_v36, %v1075_v6 }
0x1726   :  { %1171 = vrot.lane.b32.xlu0 %v1168_v39, %s2679_s3  ;;  %v1169_v50 = vmul.f32 %v1168_v39, %v1055_v11 }
0x1797   :  { %v1192_v40 = vpop.permute.xlu1 %1191 }
0x1798   :  { %v1194_v41 = vmul.f32 %v1192_v40, %v1188_v36  ;;  %v1172_v42 = vpop.permute.xlu0 %1171 }
0x1799   :  { %v1174_v45 = vmul.f32 %v1172_v42, %v1168_v39 }
0x179a   :  { %1196 = vrot.lane.b32.xlu1 %v1194_v41, %s2680_s18 }
0x179b   :  { %1176 = vrot.lane.b32.xlu0 %v1174_v45, %s2680_s18  ;;  %v1416_v45 = vrot.slane %v2851_v29, 4 }
0x180c   :  { %v1197_v47 = vpop.permute.xlu1 %1196 }
0x180d   :  { %v1199_v51 = vadd.f32 %v1197_v47, %v1189_v46  ;;  %v1177_v52 = vpop.permute.xlu0 %1176 }
0x180e   :  { %v1179_v53 = vadd.f32 %v1177_v52, %v1169_v50 }
0x180f   :  { %2587 = vtanh.f32 %v1199_v51 }
0x1810   :  { %2589 = vtanh.f32 %v1179_v53 }
0x1819   :  { %v2588_v54 = vpop.eup %2587 }
0x181a   :  { %v2590_v56 = vpop.eup %2589  ;;  %1202 = vrot.lane.b32.xlu1 %v2588_v54, %s2679_s3 }
0x181b   :  { %1182 = vrot.lane.b32.xlu0 %v2590_v56, %s2679_s3 }
0x188c   :  { %v1203_v57 = vpop.permute.xlu1 %1202 }
0x188d   :  { %v1205_v58 = vmul.f32 %v1203_v57, %v1188_v36  ;;  %v1183_v59 = vpop.permute.xlu0 %1182 }
0x188e   :  { %v1185_v60 = vmul.f32 %v1183_v59, %v1168_v39 }
0x188f   :  { %1211 = vrot.lane.b32.xlu1 %v1205_v58, %s2679_s3 }
0x1890   :  { %1207 = vrot.lane.b32.xlu0 %v1185_v60, %s2680_s18 }
0x1901   :  { %v1212_v61 = vpop.permute.xlu1 %1211 }
0x1902   :  { %v1208_v62 = vpop.permute.xlu0 %1207 }
0x1903   :  { %v1214_v63 = vsel %vm206_vm5, %v1208_v62, %v1212_v61 }
0x1904   :  { %2236 = vmatmul.mubr.msk.f32.vlgmr.msra.gmra.mrb[8].mxu1 %vm208_vm6, %v1214_v63 }
0x1905   :  { %2422 = vmatpush1.bf16.msra.mxu1 %v2774_v31  ;;  %1535 = vmatprep.mubr.f32.mxu1 %v2681_v49 }
0x1906   :  { %2424 = vmatprep.subr.bf16.mxu1 %v2776_v32 }
0x1909   :  { %2426 = vmatpush1.bf16.msra.mxu1 %v2781_v37 }
0x190a   :  { %2428 = vmatprep.subr.bf16.mxu1 %v2785_v38 }
0x190d   :  { %2430 = vmatpush1.bf16.msra.mxu1 %v2789_v43 }
0x190e   :  { %2432 = vmatprep.subr.bf16.mxu1 %v2793_v44 }
0x1911   :  { %2434 = vmatpush1.bf16.msra.mxu1 %v2798_v48 }
0x1912   :  { %2452 = vmatprep.subr.bf16.mxu1 %v2772_v27 }
0x19d7   :  { %v1284_v9 = vpop.f32.mrb[8].mxu1 }
0x19d8   :  { %v1285_v0 = vadd.f32 %v1284_v9, %v2753_v8  ;;  %v1286_v2 = vpop.f32.mrb[9].mxu1 }
0x19d9   :  { %v1287_v3 = vadd.f32 %v1286_v2, %v2822_v55 }
0x19da   :  { %v1292_v4 = vadd.f32 %v1290_v1, %v1285_v0 }
0x19db   :  { %2591 = vtanh.f32 %v1287_v3 }
0x19dc   :  { %2593 = vtanh.f32 %v1292_v4 }
0x19e5   :  { %v2592_v5 = vpop.eup %2591 }
0x19e6   :  { %v2594_v6 = vpop.eup %2593  ;;  %v1314_v7 = vmul.f32 %v2592_v5, %v2761_v14 }
0x19e7   :  { %v1294_v11 = vmul.f32 %v2594_v6, %v2761_v14 }
0x19e8   :  { %v1315_v12 = vadd.f32 %v1314_v7, %v2763_v16 }
0x19e9   :  { %v1295_v13 = vadd.f32 %v1294_v11, %v2763_v16 }
0x19ea   :  { %1318 = vrot.lane.b32.xlu1 %v1315_v12, %s2679_s3  ;;  %v1316_v20 = vmul.f32 %v1315_v12, %v1199_v51 }
0x19eb   :  { %1298 = vrot.lane.b32.xlu0 %v1295_v13, %s2679_s3  ;;  %v1296_v22 = vmul.f32 %v1295_v13, %v1179_v53 }
0x1a5c   :  { %v1319_v15 = vpop.permute.xlu1 %1318 }
0x1a5d   :  { %v1321_v17 = vmul.f32 %v1319_v15, %v1315_v12  ;;  %v1299_v18 = vpop.permute.xlu0 %1298 }
0x1a5e   :  { %v1301_v19 = vmul.f32 %v1299_v18, %v1295_v13 }
0x1a5f   :  { %1323 = vrot.lane.b32.xlu1 %v1321_v17, %s2680_s18 }
0x1a60   :  { %1303 = vrot.lane.b32.xlu0 %v1301_v19, %s2680_s18  ;;  %v1542_v19 = vrot.slane %v2851_v29, 6 }
0x1ad1   :  { %v1324_v21 = vpop.permute.xlu1 %1323 }
0x1ad2   :  { %v1326_v23 = vadd.f32 %v1324_v21, %v1316_v20  ;;  %v1304_v24 = vpop.permute.xlu0 %1303 }
0x1ad3   :  { %v1306_v25 = vadd.f32 %v1304_v24, %v1296_v22 }
0x1ad4   :  { %2595 = vtanh.f32 %v1326_v23 }
0x1ad5   :  { %2597 = vtanh.f32 %v1306_v25 }
0x1ade   :  { %v2596_v10 = vpop.eup %2595 }
0x1adf   :  { %v2598_v26 = vpop.eup %2597  ;;  %1329 = vrot.lane.b32.xlu1 %v2596_v10, %s2679_s3 }
0x1ae0   :  { %1309 = vrot.lane.b32.xlu0 %v2598_v26, %s2679_s3 }
0x1b51   :  { %v1330_v30 = vpop.permute.xlu1 %1329 }
0x1b52   :  { %v1332_v33 = vmul.f32 %v1330_v30, %v1315_v12  ;;  %v1310_v34 = vpop.permute.xlu0 %1309 }
0x1b53   :  { %v1312_v35 = vmul.f32 %v1310_v34, %v1295_v13 }
0x1b54   :  { %1338 = vrot.lane.b32.xlu1 %v1332_v33, %s2679_s3 }
0x1b55   :  { %1334 = vrot.lane.b32.xlu0 %v1312_v35, %s2680_s18 }
0x1bc6   :  { %v1339_v36 = vpop.permute.xlu1 %1338 }
0x1bc7   :  { %v1335_v39 = vpop.permute.xlu0 %1334 }
0x1bc8   :  { %v1341_v40 = vsel %vm206_vm5, %v1335_v39, %v1339_v36 }
0x1bc9   :  { %2237 = vmatmul.mubr.msk.f32.vlgmr.msra.gmra.mrb[12].mxu0 %vm208_vm6, %v1341_v40 }
0x1bca   :  { %2438 = vmatpush1.bf16.msra.mxu0 %v2774_v31  ;;  %1661 = vmatprep.mubr.f32.mxu0 %v2681_v49 }
0x1bcb   :  { %2440 = vmatprep.subr.bf16.mxu0 %v2776_v32 }
0x1bce   :  { %2442 = vmatpush1.bf16.msra.mxu0 %v2781_v37 }
0x1bcf   :  { %2444 = vmatprep.subr.bf16.mxu0 %v2785_v38 }
0x1bd2   :  { %2446 = vmatpush1.bf16.msra.mxu0 %v2789_v43 }
0x1bd3   :  { %2448 = vmatprep.subr.bf16.mxu0 %v2793_v44 }
0x1bd6   :  { %2450 = vmatpush1.bf16.msra.mxu0 %v2798_v48 }
0x1bd7   :  { %2468 = vmatprep.subr.bf16.mxu0 %v2772_v27 }
0x1c9c   :  { %v1411_v41 = vpop.f32.mrb[12].mxu0 }
0x1c9d   :  { %v1412_v42 = vadd.f32 %v1411_v41, %v2753_v8  ;;  %v1413_v46 = vpop.f32.mrb[13].mxu0 }
0x1c9e   :  { %v1414_v47 = vadd.f32 %v1413_v46, %v2822_v55 }
0x1c9f   :  { %v1418_v50 = vadd.f32 %v1416_v45, %v1412_v42 }
0x1ca0   :  { %2599 = vtanh.f32 %v1414_v47 }
0x1ca1   :  { %2601 = vtanh.f32 %v1418_v50 }
0x1caa   :  { %v2600_v51 = vpop.eup %2599 }
0x1cab   :  { %v2602_v52 = vpop.eup %2601  ;;  %v1440_v53 = vmul.f32 %v2600_v51, %v2761_v14 }
0x1cac   :  { %v1420_v54 = vmul.f32 %v2602_v52, %v2761_v14 }
0x1cad   :  { %v1441_v56 = vadd.f32 %v1440_v53, %v2763_v16 }
0x1cae   :  { %v1421_v57 = vadd.f32 %v1420_v54, %v2763_v16 }
0x1caf   :  { %1444 = vrot.lane.b32.xlu1 %v1441_v56, %s2679_s3  ;;  %v1442_v62 = vmul.f32 %v1441_v56, %v1326_v23 }
0x1cb0   :  { %1424 = vrot.lane.b32.xlu0 %v1421_v57, %s2679_s3  ;;  %v1422_v9 = vmul.f32 %v1421_v57, %v1306_v25 }
0x1d21   :  { %v1445_v58 = vpop.permute.xlu1 %1444 }
0x1d22   :  { %v1447_v59 = vmul.f32 %v1445_v58, %v1441_v56  ;;  %v1425_v60 = vpop.permute.xlu0 %1424 }
0x1d23   :  { %v1427_v61 = vmul.f32 %v1425_v60, %v1421_v57 }
0x1d24   :  { %1449 = vrot.lane.b32.xlu1 %v1447_v59, %s2680_s18 }
0x1d25   :  { %1429 = vrot.lane.b32.xlu0 %v1427_v61, %s2680_s18 }
0x1d96   :  { %v1450_v63 = vpop.permute.xlu1 %1449 }
0x1d97   :  { %v1452_v0 = vadd.f32 %v1450_v63, %v1442_v62  ;;  %v1430_v1 = vpop.permute.xlu0 %1429 }
0x1d98   :  { %v1432_v2 = vadd.f32 %v1430_v1, %v1422_v9 }
0x1d99   :  { %2603 = vtanh.f32 %v1452_v0 }
0x1d9a   :  { %2605 = vtanh.f32 %v1432_v2 }
0x1da3   :  { %v2604_v3 = vpop.eup %2603 }
0x1da4   :  { %v2606_v4 = vpop.eup %2605  ;;  %1455 = vrot.lane.b32.xlu1 %v2604_v3, %s2679_s3 }
0x1da5   :  { %1435 = vrot.lane.b32.xlu0 %v2606_v4, %s2679_s3 }
0x1e16   :  { %v1456_v5 = vpop.permute.xlu1 %1455 }
0x1e17   :  { %v1458_v6 = vmul.f32 %v1456_v5, %v1441_v56  ;;  %v1436_v7 = vpop.permute.xlu0 %1435 }
0x1e18   :  { %v1438_v11 = vmul.f32 %v1436_v7, %v1421_v57 }
0x1e19   :  { %1464 = vrot.lane.b32.xlu1 %v1458_v6, %s2679_s3 }
0x1e1a   :  { %1460 = vrot.lane.b32.xlu0 %v1438_v11, %s2680_s18 }
0x1e8b   :  { %v1465_v12 = vpop.permute.xlu1 %1464 }
0x1e8c   :  { %v1461_v13 = vpop.permute.xlu0 %1460 }
0x1e8d   :  { %v1467_v15 = vsel %vm206_vm5, %v1461_v13, %v1465_v12 }
0x1e8e   :  { %2238 = vmatmul.mubr.msk.f32.vlgmr.msra.gmra.mrb[10].mxu1 %vm208_vm6, %v1467_v15 }
0x1e8f   :  { %2454 = vmatpush1.bf16.msra.mxu1 %v2774_v31  ;;  %1785 = vmatprep.mubr.f32.mxu1 %v2681_v49 }
0x1e90   :  { %2456 = vmatprep.subr.bf16.mxu1 %v2776_v32 }
0x1e93   :  { %2458 = vmatpush1.bf16.msra.mxu1 %v2781_v37 }
0x1e94   :  { %2460 = vmatprep.subr.bf16.mxu1 %v2785_v38 }
0x1e97   :  { %2462 = vmatpush1.bf16.msra.mxu1 %v2789_v43 }
0x1e98   :  { %2464 = vmatprep.subr.bf16.mxu1 %v2793_v44 }
0x1e9b   :  { %2466 = vmatpush1.bf16.msra.mxu1 %v2798_v48 }
0x1e9c   :  { %2484 = vmatprep.subr.bf16.mxu1 %v2772_v27 }
0x1f61   :  { %v1537_v17 = vpop.f32.mrb[10].mxu1 }
0x1f62   :  { %v1538_v18 = vadd.f32 %v1537_v17, %v2753_v8  ;;  %v1539_v20 = vpop.f32.mrb[11].mxu1 }
0x1f63   :  { %v1540_v21 = vadd.f32 %v1539_v20, %v2822_v55 }
0x1f64   :  { %v1544_v22 = vadd.f32 %v1542_v19, %v1538_v18 }
0x1f65   :  { %2607 = vtanh.f32 %v1540_v21 }
0x1f66   :  { %2609 = vtanh.f32 %v1544_v22 }
0x1f6f   :  { %v2608_v23 = vpop.eup %2607 }
0x1f70   :  { %v2610_v24 = vpop.eup %2609  ;;  %v1566_v25 = vmul.f32 %v2608_v23, %v2761_v14 }
0x1f71   :  { %v1546_v10 = vmul.f32 %v2610_v24, %v2761_v14 }
0x1f72   :  { %v1567_v26 = vadd.f32 %v1566_v25, %v2763_v16 }
0x1f73   :  { %v1547_v30 = vadd.f32 %v1546_v10, %v2763_v16 }
0x1f74   :  { %1570 = vrot.lane.b32.xlu1 %v1567_v26, %s2679_s3  ;;  %v1568_v36 = vmul.f32 %v1567_v26, %v1452_v0 }
0x1f75   :  { %1550 = vrot.lane.b32.xlu0 %v1547_v30, %s2679_s3  ;;  %v1548_v40 = vmul.f32 %v1547_v30, %v1432_v2 }
0x1fe6   :  { %v1571_v29 = vpop.permute.xlu1 %1570 }
0x1fe7   :  { %v1573_v33 = vmul.f32 %v1571_v29, %v1567_v26  ;;  %v1551_v34 = vpop.permute.xlu0 %1550  ;;  %v1793_v29 = vrot.slane %v2849_v28, 2 }
0x1fe8   :  { %v1553_v35 = vmul.f32 %v1551_v34, %v1547_v30 }
0x1fe9   :  { %1575 = vrot.lane.b32.xlu1 %v1573_v33, %s2680_s18 }
0x1fea   :  { %1555 = vrot.lane.b32.xlu0 %v1553_v35, %s2680_s18 }
0x205b   :  { %v1576_v39 = vpop.permute.xlu1 %1575 }
0x205c   :  { %v1578_v41 = vadd.f32 %v1576_v39, %v1568_v36  ;;  %v1556_v42 = vpop.permute.xlu0 %1555 }
0x205d   :  { %v1558_v45 = vadd.f32 %v1556_v42, %v1548_v40 }
0x205e   :  { %2611 = vtanh.f32 %v1578_v41 }
0x205f   :  { %2613 = vtanh.f32 %v1558_v45 }
0x2068   :  { %v2612_v46 = vpop.eup %2611 }
0x2069   :  { %v2614_v47 = vpop.eup %2613  ;;  %1581 = vrot.lane.b32.xlu1 %v2612_v46, %s2679_s3 }
0x206a   :  { %1561 = vrot.lane.b32.xlu0 %v2614_v47, %s2679_s3 }
0x20db   :  { %v1582_v50 = vpop.permute.xlu1 %1581 }
0x20dc   :  { %v1584_v51 = vmul.f32 %v1582_v50, %v1567_v26  ;;  %v1562_v52 = vpop.permute.xlu0 %1561 }
0x20dd   :  { %v1564_v53 = vmul.f32 %v1562_v52, %v1547_v30 }
0x20de   :  { %1590 = vrot.lane.b32.xlu1 %v1584_v51, %s2679_s3 }
0x20df   :  { %1586 = vrot.lane.b32.xlu0 %v1564_v53, %s2680_s18 }
0x2150   :  { %v1591_v54 = vpop.permute.xlu1 %1590 }
0x2151   :  { %v1587_v56 = vpop.permute.xlu0 %1586 }
0x2152   :  { %v1593_v57 = vsel %vm206_vm5, %v1587_v56, %v1591_v54 }
0x2153   :  { %2239 = vmatmul.mubr.msk.f32.vlgmr.msra.gmra.mrb[14].mxu0 %vm208_vm6, %v1593_v57 }
0x2154   :  { %2470 = vmatpush1.bf16.msra.mxu0 %v2774_v31  ;;  %1912 = vmatprep.mubr.f32.mxu0 %v2681_v49 }
0x2155   :  { %2472 = vmatprep.subr.bf16.mxu0 %v2776_v32 }
0x2158   :  { %2474 = vmatpush1.bf16.msra.mxu0 %v2781_v37 }
0x2159   :  { %2476 = vmatprep.subr.bf16.mxu0 %v2785_v38 }
0x215c   :  { %2478 = vmatpush1.bf16.msra.mxu0 %v2789_v43 }
0x215d   :  { %2480 = vmatprep.subr.bf16.mxu0 %v2793_v44 }
0x2160   :  { %2482 = vmatpush1.bf16.msra.mxu0 %v2798_v48 }
0x2161   :  { %2500 = vmatprep.subr.bf16.mxu0 %v2772_v27 }
0x2226   :  { %v1663_v58 = vpop.f32.mrb[14].mxu0 }
0x2227   :  { %v1664_v59 = vadd.f32 %v1663_v58, %v2753_v8  ;;  %v1665_v60 = vpop.f32.mrb[15].mxu0 }
0x2228   :  { %v1666_v61 = vadd.f32 %v1665_v60, %v2822_v55 }
0x2229   :  { %v1668_v62 = vadd.f32 %v2849_v28, %v1664_v59 }
0x222a   :  { %2615 = vtanh.f32 %v1666_v61 }
0x222b   :  { %2617 = vtanh.f32 %v1668_v62 }
0x2234   :  { %v2616_v63 = vpop.eup %2615 }
0x2235   :  { %v2618_v9 = vpop.eup %2617  ;;  %v1690_v0 = vmul.f32 %v2616_v63, %v2761_v14 }
0x2236   :  { %v1670_v1 = vmul.f32 %v2618_v9, %v2761_v14 }
0x2237   :  { %v1691_v2 = vadd.f32 %v1690_v0, %v2763_v16 }
0x2238   :  { %v1671_v27 = vadd.f32 %v1670_v1, %v2763_v16 }
0x2239   :  { %1694 = vrot.lane.b32.xlu1 %v1691_v2, %s2679_s3  ;;  %v1692_v7 = vmul.f32 %v1691_v2, %v1578_v41 }
0x223a   :  { %1674 = vrot.lane.b32.xlu0 %v1671_v27, %s2679_s3  ;;  %v1672_v12 = vmul.f32 %v1671_v27, %v1558_v45 }
0x22ab   :  { %v1695_v3 = vpop.permute.xlu1 %1694 }
0x22ac   :  { %v1697_v4 = vmul.f32 %v1695_v3, %v1691_v2  ;;  %v1675_v5 = vpop.permute.xlu0 %1674 }
0x22ad   :  { %v1677_v6 = vmul.f32 %v1675_v5, %v1671_v27 }
0x22ae   :  { %1699 = vrot.lane.b32.xlu1 %v1697_v4, %s2680_s18  ;;  %v1919_v4 = vrot.slane %v2849_v28, 4 }
0x22af   :  { %1679 = vrot.lane.b32.xlu0 %v1677_v6, %s2680_s18 }
0x2320   :  { %v1700_v11 = vpop.permute.xlu1 %1699 }
0x2321   :  { %v1702_v13 = vadd.f32 %v1700_v11, %v1692_v7  ;;  %v1680_v15 = vpop.permute.xlu0 %1679 }
0x2322   :  { %v1682_v17 = vadd.f32 %v1680_v15, %v1672_v12 }
0x2323   :  { %2619 = vtanh.f32 %v1702_v13 }
0x2324   :  { %2621 = vtanh.f32 %v1682_v17 }
0x232d   :  { %v2620_v18 = vpop.eup %2619 }
0x232e   :  { %v2622_v19 = vpop.eup %2621  ;;  %1705 = vrot.lane.b32.xlu1 %v2620_v18, %s2679_s3 }
0x232f   :  { %1685 = vrot.lane.b32.xlu0 %v2622_v19, %s2679_s3 }
0x23a0   :  { %v1706_v20 = vpop.permute.xlu1 %1705 }
0x23a1   :  { %v1708_v21 = vmul.f32 %v1706_v20, %v1691_v2  ;;  %v1686_v22 = vpop.permute.xlu0 %1685 }
0x23a2   :  { %v1688_v23 = vmul.f32 %v1686_v22, %v1671_v27 }
0x23a3   :  { %1714 = vrot.lane.b32.xlu1 %v1708_v21, %s2679_s3 }
0x23a4   :  { %1710 = vrot.lane.b32.xlu0 %v1688_v23, %s2680_s18 }
0x2415   :  { %v1715_v24 = vpop.permute.xlu1 %1714 }
0x2416   :  { %v1711_v25 = vpop.permute.xlu0 %1710 }
0x2417   :  { %v1717_v10 = vsel %vm206_vm5, %v1711_v25, %v1715_v24 }
0x2418   :  { %2240 = vmatmul.mubr.msk.f32.vlgmr.msra.gmra.mrb[12].mxu1 %vm208_vm6, %v1717_v10 }
0x2419   :  { %2486 = vmatpush1.bf16.msra.mxu1 %v2774_v31  ;;  %2038 = vmatprep.mubr.f32.mxu1 %v2681_v49 }
0x241a   :  { %2488 = vmatprep.subr.bf16.mxu1 %v2776_v32 }
0x241d   :  { %2490 = vmatpush1.bf16.msra.mxu1 %v2781_v37 }
0x241e   :  { %2492 = vmatprep.subr.bf16.mxu1 %v2785_v38 }
0x2421   :  { %2494 = vmatpush1.bf16.msra.mxu1 %v2789_v43 }
0x2422   :  { %2496 = vmatprep.subr.bf16.mxu1 %v2793_v44 }
0x2425   :  { %2498 = vmatpush1.bf16.msra.mxu1 %v2798_v48 }
0x24eb   :  { %v1787_v26 = vpop.f32.mrb[12].mxu1 }
0x24ec   :  { %v1788_v30 = vadd.f32 %v1787_v26, %v2753_v8  ;;  %v1789_v33 = vpop.f32.mrb[13].mxu1 }
0x24ed   :  { %v1790_v34 = vadd.f32 %v1789_v33, %v2822_v55 }
0x24ee   :  { %v1795_v35 = vadd.f32 %v1793_v29, %v1788_v30 }
0x24ef   :  { %2623 = vtanh.f32 %v1790_v34 }
0x24f0   :  { %2625 = vtanh.f32 %v1795_v35  ;;  %v2045_v35 = vrot.slane %v2849_v28, 6 }
0x24f9   :  { %v2624_v36 = vpop.eup %2623 }
0x24fa   :  { %v2626_v39 = vpop.eup %2625  ;;  %v1817_v40 = vmul.f32 %v2624_v36, %v2761_v14 }
0x24fb   :  { %v1797_v41 = vmul.f32 %v2626_v39, %v2761_v14 }
0x24fc   :  { %v1818_v42 = vadd.f32 %v1817_v40, %v2763_v16 }
0x24fd   :  { %v1798_v45 = vadd.f32 %v1797_v41, %v2763_v16 }
0x24fe   :  { %1821 = vrot.lane.b32.xlu1 %v1818_v42, %s2679_s3  ;;  %v1819_v52 = vmul.f32 %v1818_v42, %v1702_v13 }
0x24ff   :  { %1801 = vrot.lane.b32.xlu0 %v1798_v45, %s2679_s3  ;;  %v1799_v54 = vmul.f32 %v1798_v45, %v1682_v17 }
0x2570   :  { %v1822_v46 = vpop.permute.xlu1 %1821 }
0x2571   :  { %v1824_v47 = vmul.f32 %v1822_v46, %v1818_v42  ;;  %v1802_v50 = vpop.permute.xlu0 %1801 }
0x2572   :  { %v1804_v51 = vmul.f32 %v1802_v50, %v1798_v45 }
0x2573   :  { %1826 = vrot.lane.b32.xlu1 %v1824_v47, %s2680_s18 }
0x2574   :  { %1806 = vrot.lane.b32.xlu0 %v1804_v51, %s2680_s18 }
0x25e5   :  { %v1827_v53 = vpop.permute.xlu1 %1826 }
0x25e6   :  { %v1829_v56 = vadd.f32 %v1827_v53, %v1819_v52  ;;  %v1807_v57 = vpop.permute.xlu0 %1806 }
0x25e7   :  { %v1809_v58 = vadd.f32 %v1807_v57, %v1799_v54 }
0x25e8   :  { %2627 = vtanh.f32 %v1829_v56 }
0x25e9   :  { %2629 = vtanh.f32 %v1809_v58 }
0x25f2   :  { %v2628_v59 = vpop.eup %2627 }
0x25f3   :  { %v2630_v60 = vpop.eup %2629  ;;  %1832 = vrot.lane.b32.xlu1 %v2628_v59, %s2679_s3 }
0x25f4   :  { %1812 = vrot.lane.b32.xlu0 %v2630_v60, %s2679_s3 }
0x2665   :  { %v1833_v61 = vpop.permute.xlu1 %1832 }
0x2666   :  { %v1835_v62 = vmul.f32 %v1833_v61, %v1818_v42  ;;  %v1813_v63 = vpop.permute.xlu0 %1812 }
0x2667   :  { %v1815_v9 = vmul.f32 %v1813_v63, %v1798_v45 }
0x2668   :  { %1841 = vrot.lane.b32.xlu1 %v1835_v62, %s2679_s3 }
0x2669   :  { %1837 = vrot.lane.b32.xlu0 %v1815_v9, %s2680_s18 }
0x26da   :  { %v1842_v0 = vpop.permute.xlu1 %1841 }
0x26db   :  { %v1838_v1 = vpop.permute.xlu0 %1837 }
0x26dc   :  { %v1844_v2 = vsel %vm206_vm5, %v1838_v1, %v1842_v0 }
0x26dd   :  { %2241 = vmatmul.mubr.msk.f32.vlgmr.msra.gmra.mrb[16].mxu0 %vm208_vm6, %v1844_v2 }
0x26de   :  { %2502 = vmatpush1.bf16.msra.mxu0 %v2774_v31  ;;  %2164 = vmatprep.mubr.f32.mxu0 %v2681_v49 }
0x26df   :  { %2504 = vmatprep.subr.bf16.mxu0 %v2776_v32 }
0x26e2   :  { %2506 = vmatpush1.bf16.msra.mxu0 %v2781_v37 }
0x26e3   :  { %2508 = vmatprep.subr.bf16.mxu0 %v2785_v38 }
0x26e6   :  { %2510 = vmatpush1.bf16.msra.mxu0 %v2789_v43 }
0x26e7   :  { %2512 = vmatprep.subr.bf16.mxu0 %v2793_v44 }
0x26ea   :  { %2514 = vmatpush1.bf16.msra.mxu0 %v2798_v48 }
0x27b0   :  { %v1914_v27 = vpop.f32.mrb[16].mxu0 }
0x27b1   :  { %v1915_v3 = vadd.f32 %v1914_v27, %v2753_v8  ;;  %v1916_v31 = vpop.f32.mrb[17].mxu0 }
0x27b2   :  { %v1917_v49 = vadd.f32 %v1916_v31, %v2822_v55 }
0x27b3   :  { %v1921_v5 = vadd.f32 %v1919_v4, %v1915_v3 }
0x27b4   :  { %2631 = vtanh.f32 %v1917_v49 }
0x27b5   :  { %2633 = vtanh.f32 %v1921_v5 }
0x27be   :  { %v2632_v32 = vpop.eup %2631 }
0x27bf   :  { %v2634_v37 = vpop.eup %2633  ;;  %v1943_v38 = vmul.f32 %v2632_v32, %v2761_v14 }
0x27c0   :  { %v1923_v43 = vmul.f32 %v2634_v37, %v2761_v14 }
0x27c1   :  { %v1944_v44 = vadd.f32 %v1943_v38, %v2763_v16 }
0x27c2   :  { %v1924_v48 = vadd.f32 %v1923_v43, %v2763_v16  ;;  %v2244_v43 = vld [vmem:[%s3225_s4] ss:$0 sm:$0xff] }
0x27c3   :  { %1947 = vrot.lane.b32.xlu1 %v1944_v44, %s2679_s3  ;;  %v1945_v13 = vmul.f32 %v1944_v44, %v1829_v56 }
0x27c4   :  { %1927 = vrot.lane.b32.xlu0 %v1924_v48, %s2679_s3  ;;  %v1925_v17 = vmul.f32 %v1924_v48, %v1809_v58 }
0x2835   :  { %v1948_v6 = vpop.permute.xlu1 %1947 }
0x2836   :  { %v1950_v7 = vmul.f32 %v1948_v6, %v1944_v44  ;;  %v1928_v11 = vpop.permute.xlu0 %1927 }
0x2837   :  { %v1930_v12 = vmul.f32 %v1928_v11, %v1924_v48 }
0x2838   :  { %1952 = vrot.lane.b32.xlu1 %v1950_v7, %s2680_s18 }
0x2839   :  { %1932 = vrot.lane.b32.xlu0 %v1930_v12, %s2680_s18 }
0x28aa   :  { %v1953_v15 = vpop.permute.xlu1 %1952 }
0x28ab   :  { %v1955_v18 = vadd.f32 %v1953_v15, %v1945_v13  ;;  %v1933_v19 = vpop.permute.xlu0 %1932  ;;  %v2245_v15 = vld [vmem:[#allocation2] ss:$0 sm:$0xff] }
0x28ac   :  { %v1935_v20 = vadd.f32 %v1933_v19, %v1925_v17 }
0x28ad   :  { %2635 = vtanh.f32 %v1955_v18 }
0x28ae   :  { %2637 = vtanh.f32 %v1935_v20 }
0x28b7   :  { %v2636_v21 = vpop.eup %2635 }
0x28b8   :  { %v2638_v22 = vpop.eup %2637  ;;  %1958 = vrot.lane.b32.xlu1 %v2636_v21, %s2679_s3 }
0x28b9   :  { %1938 = vrot.lane.b32.xlu0 %v2638_v22, %s2679_s3 }
0x292a   :  { %v1959_v23 = vpop.permute.xlu1 %1958 }
0x292b   :  { %v1961_v24 = vmul.f32 %v1959_v23, %v1944_v44  ;;  %v1939_v25 = vpop.permute.xlu0 %1938 }
0x292c   :  { %v1941_v10 = vmul.f32 %v1939_v25, %v1924_v48 }
0x292d   :  { %1967 = vrot.lane.b32.xlu1 %v1961_v24, %s2679_s3 }
0x292e   :  { %1963 = vrot.lane.b32.xlu0 %v1941_v10, %s2680_s18 }
0x299f   :  { %v1968_v26 = vpop.permute.xlu1 %1967 }
0x29a0   :  { %v1964_v30 = vpop.permute.xlu0 %1963 }
0x29a1   :  { %v1970_v29 = vsel %vm206_vm5, %v1964_v30, %v1968_v26 }
0x29a2   :  { %2242 = vmatmul.mubr.msk.f32.vlgmr.msra.gmra.mrb[14].mxu1 %vm208_vm6, %v1970_v29 }
0x2a75   :  { %v2040_v33 = vpop.f32.mrb[14].mxu1 }
0x2a76   :  { %v2041_v34 = vadd.f32 %v2040_v33, %v2753_v8  ;;  %v2042_v36 = vpop.f32.mrb[15].mxu1 }
0x2a77   :  { %v2043_v39 = vadd.f32 %v2042_v36, %v2822_v55 }
0x2a78   :  { %v2047_v40 = vadd.f32 %v2045_v35, %v2041_v34 }
0x2a79   :  { %2639 = vtanh.f32 %v2043_v39 }
0x2a7a   :  { %2641 = vtanh.f32 %v2047_v40 }
0x2a83   :  { %v2640_v41 = vpop.eup %2639 }
0x2a84   :  { %v2642_v42 = vpop.eup %2641  ;;  %v2069_v45 = vmul.f32 %v2640_v41, %v2761_v14 }
0x2a85   :  { %v2049_v46 = vmul.f32 %v2642_v42, %v2761_v14 }
0x2a86   :  { %v2070_v47 = vadd.f32 %v2069_v45, %v2763_v16 }
0x2a87   :  { %v2050_v50 = vadd.f32 %v2049_v46, %v2763_v16 }
0x2a88   :  { %2073 = vrot.lane.b32.xlu1 %v2070_v47, %s2679_s3  ;;  %v2071_v53 = vmul.f32 %v2070_v47, %v1955_v18 }
0x2a89   :  { %2053 = vrot.lane.b32.xlu0 %v2050_v50, %s2679_s3  ;;  %v2051_v56 = vmul.f32 %v2050_v50, %v1935_v20 }
0x2afa   :  { %v2074_v8 = vpop.permute.xlu1 %2073 }
0x2afb   :  { %v2076_v28 = vmul.f32 %v2074_v8, %v2070_v47  ;;  %v2054_v51 = vpop.permute.xlu0 %2053 }
0x2afc   :  { %v2056_v52 = vmul.f32 %v2054_v51, %v2050_v50 }
0x2afd   :  { %2078 = vrot.lane.b32.xlu1 %v2076_v28, %s2680_s18 }
0x2afe   :  { %2058 = vrot.lane.b32.xlu0 %v2056_v52, %s2680_s18 }
0x2b6f   :  { %v2079_v54 = vpop.permute.xlu1 %2078 }
0x2b70   :  { %v2081_v57 = vadd.f32 %v2079_v54, %v2071_v53  ;;  %v2059_v58 = vpop.permute.xlu0 %2058 }
0x2b71   :  { %v2061_v59 = vadd.f32 %v2059_v58, %v2051_v56 }
0x2b72   :  { %2643 = vtanh.f32 %v2081_v57 }
0x2b73   :  { %2645 = vtanh.f32 %v2061_v59 }
0x2b7c   :  { %v2644_v60 = vpop.eup %2643 }
0x2b7d   :  { %v2646_v61 = vpop.eup %2645  ;;  %2084 = vrot.lane.b32.xlu1 %v2644_v60, %s2679_s3 }
0x2b7e   :  { %2064 = vrot.lane.b32.xlu0 %v2646_v61, %s2679_s3 }
0x2bef   :  { %v2085_v62 = vpop.permute.xlu1 %2084 }
0x2bf0   :  { %v2087_v63 = vmul.f32 %v2085_v62, %v2070_v47  ;;  %v2065_v9 = vpop.permute.xlu0 %2064 }
0x2bf1   :  { %v2067_v0 = vmul.f32 %v2065_v9, %v2050_v50 }
0x2bf2   :  { %2093 = vrot.lane.b32.xlu1 %v2087_v63, %s2679_s3 }
0x2bf3   :  { %2089 = vrot.lane.b32.xlu0 %v2067_v0, %s2680_s18 }
0x2c64   :  { %v2094_v1 = vpop.permute.xlu1 %2093 }
0x2c65   :  { %v2090_v2 = vpop.permute.xlu0 %2089 }
0x2c66   :  { %v2096_v27 = vsel %vm206_vm5, %v2090_v2, %v2094_v1 }
0x2c67   :  { %2243 = vmatmul.mubr.msk.f32.vlgmr.msra.gmra.mrb[18].mxu0 %vm208_vm6, %v2096_v27 }
0x2d3a   :  { %v2166_v3 = vpop.f32.mrb[18].mxu0 }
0x2d3b   :  { %v2167_v4 = vpop.f32.mrb[19].mxu0 }
0x2d3c   :  { %v2168_v31 = vadd.f32 %v2167_v4, %v2822_v55 }
0x2d3e   :  { %2647 = vtanh.f32 %v2168_v31 }
0x2d48   :  { %v2648_v49 = vpop.eup %2647 }
0x2d49   :  { %v2171_v5 = vmul.f32 %v2648_v49, %v2761_v14 }
0x2d4b   :  { %v2172_v32 = vadd.f32 %v2171_v5, %v2763_v16 }
0x2d4d   :  { %2175 = vrot.lane.b32.xlu0 %v2172_v32, %s2679_s3  ;;  %v2173_v44 = vmul.f32 %v2172_v32, %v2081_v57 }
0x2dbf   :  { %v2176_v37 = vpop.permute.xlu0 %2175 }
0x2dc0   :  { %v2178_v38 = vmul.f32 %v2176_v37, %v2172_v32 }
0x2dc2   :  { %2180 = vrot.lane.b32.xlu1 %v2178_v38, %s2680_s18 }
0x2dc6   :  { %2196 = vrot.lane.b32.xlu1 %v2244_v43, %s2682_s24 }
0x2e34   :  { %v2181_v55 = vpop.permute.xlu1 %2180 }
0x2e35   :  { %v2183_v48 = vadd.f32 %v2181_v55, %v2173_v44 }
0x2e37   :  { %2649 = vtanh.f32 %v2183_v48 }
0x2e38   :  { %v2197_v16 = vpop.permute.xlu1 %2196 }
0x2e41   :  { %v2650_v6 = vpop.eup %2649 }
0x2e42   :  { %2186 = vrot.lane.b32.xlu0 %v2650_v6, %s2679_s3 }
0x2eb4   :  { %v2187_v14 = vpop.permute.xlu0 %2186 }
0x2eb5   :  { %v2189_v7 = vmul.f32 %v2187_v14, %v2172_v32 }
0x2eb7   :  { %v2199_v11 = vmul.f32 %v2197_v16, %v2189_v7 }
0x2eb9   :  { %2201 = vrot.lane.b32.xlu0 %v2199_v11, %s2680_s18 }
0x2f2b   :  { %v2202_v12 = vpop.permute.xlu0 %2201 }
0x2f2c   :  { %v2205_v13 = vsel %vm2204_vm7, %v2202_v12, 0.0 }
0x2f2d   :  { %2206 = vadd.xlane.f32.xlu1 %v2205_v13 }
0x2fba   :  { %v2207_v17 = vpop.xlane.xlu1 %2206 }
0x2fbb   :  { %v2215_v18 = vadd.f32 %v2245_v15, %v2207_v17 }
0x2fbd   :  { %2217 = vst.msk [vmem:[%s3227_s6] sm:$0x3] %vm2216_vm8, %v2215_v18 }
0x2fbe   :  { %2222 = vsyncpa [#allocation4], 1 }

</bundles_post_ra>
